<compile_context>
chip_gen: v6e
topology: v6e:2x2x1
jax: 0.10.0
libtpu: 0.0.40
codegen_flags: <defaults>
</compile_context>

<pallas_src>
import functools

import jax
import jax.numpy as jnp
from jax.experimental import pallas as pl
from jax.experimental.pallas import tpu as pltpu

DIM = 128      # MoCo feature dim (matches default dim=128)
K_QUEUE = 512  # queue length (65536 in original; scaled down, K % batch == 0)
M_MOM = 0.999  # momentum
T_TEMP = 0.07  # temperature
C_MID = 16     # stand-in encoder hidden channels

_LEAF_ORDER = ("conv_w", "conv_b", "fc_w", "fc_b")


def _queue_tile(kq):
    # Largest queue tile that divides K.  At real MoCo sizes (K=65536) cap at
    # 4096 so the double-buffered (tn,128) bf16 queue stream + (N,tn) f32
    # output tile stay well under v7x's 64 MiB VMEM / 32 MiB scoped default.
    for cand in (4096, 2048, 1024, 512, 256, 128):
        if cand <= kq and kq % cand == 0:
            return cand
    return kq


# --------------------------- 1. momentum update -----------------------------

def _momentum_kernel(*refs, m, n_leaves):
    q_refs = refs[:n_leaves]
    k_refs = refs[n_leaves:2 * n_leaves]
    o_refs = refs[2 * n_leaves:]
    for qr, kr, orr in zip(q_refs, k_refs, o_refs):
        orr[...] = m * kr[...] + (1.0 - m) * qr[...]


def pallas_momentum_update(params_q, params_k, m):
    """param_k = m*param_k + (1-m)*param_q for every leaf, one pallas_call.

    Each k-leaf is aliased to its output, so together with jit donation of
    params_k the update happens in place (no flatten/concat/reassembly glue).
    TODO(synk): for a real ResNet-18 (~45 MB) store the params in a persistent
    flattened (rows, 512) master buffer and tile >=2 MiB blocks per grid step.
    """
    leaves_q = [params_q[n] for n in _LEAF_ORDER]
    leaves_k = [params_k[n] for n in _LEAF_ORDER]
    n = len(_LEAF_ORDER)

    def full_spec(a):
        nd = a.ndim
        return pl.BlockSpec(a.shape, lambda *_: (0,) * nd)

    out = pl.pallas_call(
        functools.partial(_momentum_kernel, m=float(m), n_leaves=n),
        out_shape=tuple(jax.ShapeDtypeStruct(a.shape, a.dtype) for a in leaves_k),
        grid=(1,),
        in_specs=[full_spec(a) for a in leaves_q]
                + [full_spec(a) for a in leaves_k],
        out_specs=tuple(full_spec(a) for a in leaves_k),
        input_output_aliases={n + i: i for i in range(n)},   # k-leaves in place
        compiler_params=pltpu.CompilerParams(dimension_semantics=("arbitrary",)),
    )(*leaves_q, *leaves_k)
    return dict(zip(_LEAF_ORDER, out))


# ------------------- 2. fused encoder (both param sets) ---------------------

def _encoder_kernel(x_ref, t_ref, cb_ref, pf_ref, fb_ref, o_ref, *, h_img, n_img):
    """conv3x3 (banded matmul) + bias + ReLU + global-avg-pool + FC, fused.

    x_ref : (1, N*H, 3*RPAD)  bf16 pre-stacked image bands (lane-concatenated)
    t_ref : (1, 3*RPAD, W*CM) bf16 banded (Toeplitz) conv weights
    cb_ref: (1, 1, W*CM)      f32 conv bias tiled per spatial column
    pf_ref: (1, W*CM, DIM)    bf16 pooling (incl. 1/(H*W)) folded into FC weight
    fb_ref: (1, 1, DIM)       f32 fc bias
    o_ref : (1, N, DIM)       f32 encoder features
    """
    # Single MXU call per grid step: (N*H, 3*RPAD) @ (3*RPAD, W*CM), f32 acc.
    acc = jnp.dot(x_ref[0], t_ref[0], preferred_element_type=jnp.float32)
    y = jnp.maximum(acc + cb_ref[0], 0.0)                 # conv + bias + ReLU
    # Reduce over H per image (aligned 16-row slices, no relayout).
    ysum = jnp.concatenate(
        [jnp.sum(y[i * h_img:(i + 1) * h_img], axis=0, keepdims=True)
         for i in range(n_img)], axis=0)                  # (N, W*CM)
    # Reduce over W (and 1/(H*W)) folded into the FC weight -> one matmul.
    feats = jnp.dot(ysum.astype(jnp.bfloat16), pf_ref[0],
                    preferred_element_type=jnp.float32) + fb_ref[0]
    o_ref[0] = feats


def make_encoder_consts(c, h, w, cm):
    """Parameter-independent conv preprocessing, computed once at init."""
    shifts = jnp.stack([jnp.eye(w + 2, w, k=-dj, dtype=jnp.float32)
                        for dj in range(3)])                       # (3, W+2, W)
    pool = jnp.tile(jnp.eye(cm, dtype=jnp.float32), (w, 1)) / float(h * w)
    return shifts, pool                                            # pool: (W*CM, CM)


def pallas_encoder_pair(params_q, params_k, im_q, im_k, shifts, pool):
    """Run both encoders (q-params on im_q, k-params on im_k) in ONE kernel.

    Grid = (2,) over the parameter sets ("parallel" -> one per v7x core); each
    grid step stacks all N images so the conv matmul has M = N*H rows.
    TODO(synk): at real image sizes (224x224) replace the banded-Toeplitz rhs
    with a shifted-accumulate direct conv to respect v7x's 64 MiB VMEM.
    """
    n, c, h, w = im_q.shape
    cm = C_MID
    wcm = w * cm
    r0 = (w + 2) * c
    rpad = max(128, -(-r0 // 128) * 128)                 # lane-padded band width

    # ---- images: padded rows, channels in lanes, 3 bands pre-stacked in lanes
    ims = jnp.stack([im_q, im_k])                                   # (2,N,C,H,W)
    xp = jnp.pad(ims, ((0, 0), (0, 0), (0, 0), (1, 1), (1, 1)))
    xr = xp.transpose(0, 1, 3, 4, 2).reshape(2, n, h + 2, r0)       # (2,N,H+2,R0)
    band_list = [jnp.pad(xr[:, :, di:di + h, :],
                         ((0, 0), (0, 0), (0, 0), (0, rpad - r0)))
                 for di in range(3)]                                # 3x (2,N,H,RPAD)
    xbands = jnp.stack(band_list, axis=3)                           # (2,N,H,3,RPAD)
    xbands = xbands.reshape(2, n * h, 3 * rpad).astype(jnp.bfloat16)  # hoisted cast

    # ---- per-parameter-set weights (Toeplitz conv rhs, bias row, pooled FC)
    def per_set(p):
        kmat = p["conv_w"].reshape(cm, c, 3, 3).transpose(2, 3, 1, 0)  # (di,dj,C,CM)
        t = jnp.stack([
            jnp.einsum("jaw,jcd->acwd", shifts, kmat[di]).reshape(r0, wcm)
            for di in range(3)])                                       # (3, R0, WCM)
        t = jnp.pad(t, ((0, 0), (0, rpad - r0), (0, 0))).reshape(3 * rpad, wcm)
        brow = jnp.tile(p["conv_b"].reshape(cm), w).reshape(1, wcm)
        pf = pool @ p["fc_w"].T                                        # (WCM, DIM)
        fb = p["fc_b"].reshape(1, DIM)
        return t, brow, pf, fb

    tq, bq, pfq, fbq = per_set(params_q)
    tk, bk, pfk, fbk = per_set(params_k)
    t_all = jnp.stack([tq, tk]).astype(jnp.bfloat16)       # (2, 3*RPAD, WCM)
    b_all = jnp.stack([bq, bk]).astype(jnp.float32)        # (2, 1, WCM)
    pf_all = jnp.stack([pfq, pfk]).astype(jnp.bfloat16)    # (2, WCM, DIM)
    fb_all = jnp.stack([fbq, fbk]).astype(jnp.float32)     # (2, 1, DIM)

    feats = pl.pallas_call(
        functools.partial(_encoder_kernel, h_img=h, n_img=n),
        out_shape=jax.ShapeDtypeStruct((2, n, DIM), jnp.float32),
        grid=(2,),
        in_specs=[
            pl.BlockSpec((1, n * h, 3 * rpad), lambda s: (s, 0, 0)),
            pl.BlockSpec((1, 3 * rpad, wcm), lambda s: (s, 0, 0)),
            pl.BlockSpec((1, 1, wcm), lambda s: (s, 0, 0)),
            pl.BlockSpec((1, wcm, DIM), lambda s: (s, 0, 0)),
            pl.BlockSpec((1, 1, DIM), lambda s: (s, 0, 0)),
        ],
        out_specs=pl.BlockSpec((1, n, DIM), lambda s: (s, 0, 0)),
        compiler_params=pltpu.CompilerParams(dimension_semantics=("parallel",)),
    )(xbands, t_all, b_all, pf_all, fb_all)
    return feats    # (2, N, DIM): [0]=q features, [1]=k features


# ---------------------- 3. fused contrastive head ---------------------------

def _head_kernel(feats_ref, queue_ref, kn_ref, lpos_ref, lneg_ref, qn_sc, *, inv_t):
    # Normalize q/k, compute l_pos, and stash bf16 qn once; qn stays resident
    # in VMEM across the queue-tile axis.
    @pl.when(pl.program_id(0) == 0)
    def _():
        q = feats_ref[0]
        k = feats_ref[1]
        # F.normalize(x, dim=1) == x * rsqrt(max(sum(x^2), eps))   (EUP rsqrt)
        qn = q * jax.lax.rsqrt(jnp.maximum(jnp.sum(q * q, axis=1, keepdims=True), 1e-24))
        kn = k * jax.lax.rsqrt(jnp.maximum(jnp.sum(k * k, axis=1, keepdims=True), 1e-24))
        qn_sc[...] = qn.astype(jnp.bfloat16)   # bf16 MXU feed for l_neg
        kn_ref[...] = kn                       # f32 keys for the enqueue
        lpos = jnp.sum(qn * kn, axis=1, keepdims=True) * inv_t   # f32 l_pos
        lpos_ref[...] = jnp.broadcast_to(lpos, lpos_ref.shape)   # lane-dense store
    # l_neg tile = qn @ queue_tile.T (queue stored (K, DIM) rows, bf16 shadow).
    # NOTE: l_neg uses bf16-quantized qn/queue while l_pos is f32 (small
    # precision asymmetry vs. the f32 PyTorch reference).
    lneg_ref[...] = jax.lax.dot_general(
        qn_sc[...], queue_ref[...],
        dimension_numbers=(((1,), (1,)), ((), ())),
        preferred_element_type=jnp.float32) * inv_t


def pallas_contrastive_head(feats, queue_bf16, t):
    two, n, d = feats.shape
    kq, d2 = queue_bf16.shape
    assert two == 2 and d == d2
    tn = _queue_tile(kq)
    kn, lpos_pad, lneg = pl.pallas_call(
        functools.partial(_head_kernel, inv_t=float(1.0 / t)),
        out_shape=(jax.ShapeDtypeStruct((n, d), jnp.float32),     # normalized k
                   jax.ShapeDtypeStruct((n, 128), jnp.float32),   # l_pos, lane-dense
                   jax.ShapeDtypeStruct((n, kq), jnp.float32)),   # l_neg
        grid=(kq // tn,),
        in_specs=[pl.BlockSpec((2, n, d), lambda j: (0, 0, 0)),   # feats resident
                  pl.BlockSpec((tn, d), lambda j: (j, 0))],       # queue streamed
        out_specs=(pl.BlockSpec((n, d), lambda j: (0, 0)),
                   pl.BlockSpec((n, 128), lambda j: (0, 0)),
                   pl.BlockSpec((n, tn), lambda j: (0, j))),
        scratch_shapes=[pltpu.VMEM((n, d), jnp.bfloat16)],        # resident qn
        # kn / l_pos are resident outputs across the queue axis -> "arbitrary".
        compiler_params=pltpu.CompilerParams(dimension_semantics=("arbitrary",)),
    )(feats, queue_bf16)
    return kn, lpos_pad, lneg


# --------------------------------- glue -------------------------------------

def init_encoder_params(key, c_in=3):
    """Stand-in encoder params stored in 2D lane-friendly shapes."""
    k1, k2 = jax.random.split(key, 2)
    return {
        "conv_w": 0.1 * jax.random.normal(k1, (C_MID, c_in * 9), jnp.float32),
        "conv_b": jnp.zeros((1, C_MID), jnp.float32),
        "fc_w": 0.1 * jax.random.normal(k2, (DIM, C_MID), jnp.float32),
        "fc_b": jnp.zeros((1, DIM), jnp.float32),
    }


def moco_forward(params_q, params_k, queue_f32, queue_bf16, queue_ptr,
                 im_q, im_k, shifts, pool):
    # 1. momentum update of the key encoder (in-place aliased + donated)
    params_k_new = pallas_momentum_update(params_q, params_k, M_MOM)

    # 2. both encoders in one pallas_call (q-params on im_q, fresh k-params on im_k)
    feats = pallas_encoder_pair(params_q, params_k_new, im_q, im_k, shifts, pool)

    # 3. fused contrastive head: normalize + l_pos + queue-tiled l_neg
    kn, lpos_pad, l_neg = pallas_contrastive_head(feats, queue_bf16, T_TEMP)
    # Final (N, 1+K) logits to match the PyTorch contract; a downstream loss
    # can consume lpos_pad / l_neg directly to stay lane-dense.
    logits = jnp.concatenate([lpos_pad[:, :1], l_neg], axis=1)
    labels = jnp.zeros((logits.shape[0],), dtype=jnp.int32)  # torch.long -> int32

    # 4. _dequeue_and_enqueue: lane-dense row-stripe writes into both queue
    #    copies (f32 master + persistent bf16 MXU shadow); buffers are donated
    #    so XLA performs the updates in place.
    b = kn.shape[0]
    ptr = queue_ptr[0]
    new_queue = jax.lax.dynamic_update_slice(queue_f32, kn, (ptr, jnp.int32(0)))
    new_queue_bf16 = jax.lax.dynamic_update_slice(
        queue_bf16, kn.astype(jnp.bfloat16), (ptr, jnp.int32(0)))
    new_ptr = (queue_ptr + b) % queue_f32.shape[0]

    return logits, labels, params_k_new, new_queue, new_queue_bf16, new_ptr


if __name__ == "__main__":
    import warnings
    warnings.filterwarnings("ignore", message="Some donated buffers were not usable")

    key = jax.random.PRNGKey(0)
    k_imq, k_imk, k_enc, k_queue = jax.random.split(key, 4)

    N, C, H, W = 2, 3, 16, 16
    im_q = jax.random.normal(k_imq, (N, C, H, W), jnp.float32)
    im_k = jax.random.normal(k_imk, (N, C, H, W), jnp.float32)

    params_q = init_encoder_params(k_enc, c_in=C)
    # param_k.data.copy_(param_q.data) — real copies so the k-buffers can be donated.
    params_k = jax.tree_util.tree_map(jnp.copy, params_q)

    # Queue stored (K, DIM): each row is one unit-normalized key (equivalent to
    # the torch (dim, K) buffer normalized along dim=0), plus a bf16 shadow.
    queue = jax.random.normal(k_queue, (K_QUEUE, DIM), jnp.float32)
    queue = queue / jnp.maximum(jnp.linalg.norm(queue, axis=1, keepdims=True), 1e-12)
    queue_bf16 = queue.astype(jnp.bfloat16)
    queue_ptr = jnp.zeros((1,), dtype=jnp.int32)

    shifts, pool = make_encoder_consts(C, H, W, C_MID)

    # Donate params_k and both queue copies so the momentum update and the
    # enqueue are genuinely in place.
    fwd = jax.jit(moco_forward, donate_argnums=(1, 2, 3))
    logits, labels, params_k_new, new_queue, new_queue_bf16, new_ptr = fwd(
        params_q, params_k, queue, queue_bf16, queue_ptr, im_q, im_k, shifts, pool)
    jax.block_until_ready((logits, labels, params_k_new, new_queue,
                           new_queue_bf16, new_ptr))

    assert logits.shape == (N, 1 + K_QUEUE)
    assert logits.dtype == jnp.float32
    assert bool(jnp.all(jnp.isfinite(logits)))
    assert labels.shape == (N,)
    assert new_queue.shape == (K_QUEUE, DIM)
    # the freshly enqueued keys are unit-normalized rows
    assert bool(jnp.allclose(jnp.linalg.norm(new_queue[:N], axis=1), 1.0, atol=1e-3))
    assert int(new_ptr[0]) == N % K_QUEUE

    print("KERNEL_OK")
</pallas_src>

<mosaic_0001>
module attributes {stable_mosaic.version = 11 : i64} {
  func.func @_momentum_kernel(%arg0: i32, %arg1: memref<16x27xf32, #tpu.memory_space<vmem>>, %arg2: memref<1x16xf32, #tpu.memory_space<vmem>>, %arg3: memref<128x16xf32, #tpu.memory_space<vmem>>, %arg4: memref<1x128xf32, #tpu.memory_space<vmem>>, %arg5: memref<16x27xf32, #tpu.memory_space<vmem>>, %arg6: memref<1x16xf32, #tpu.memory_space<vmem>>, %arg7: memref<128x16xf32, #tpu.memory_space<vmem>>, %arg8: memref<1x128xf32, #tpu.memory_space<vmem>>, %arg9: memref<16x27xf32, #tpu.memory_space<vmem>>, %arg10: memref<1x16xf32, #tpu.memory_space<vmem>>, %arg11: memref<128x16xf32, #tpu.memory_space<vmem>>, %arg12: memref<1x128xf32, #tpu.memory_space<vmem>>) attributes {dimension_semantics = [#tpu.dimension_semantics<arbitrary>], iteration_bounds = array<i64: 1>, scalar_prefetch = 0 : i64, scratch_operands = 0 : i64, tpu.core_type = #tpu.core_type<tc>, window_params = [{pipeline_mode = #tpu.pipeline_mode<synchronous>, transform_indices = @transform_0, window_bounds = array<i64: 16, 27>}, {pipeline_mode = #tpu.pipeline_mode<synchronous>, transform_indices = @transform_1, window_bounds = array<i64: 1, 16>}, {pipeline_mode = #tpu.pipeline_mode<synchronous>, transform_indices = @transform_2, window_bounds = array<i64: 128, 16>}, {pipeline_mode = #tpu.pipeline_mode<synchronous>, transform_indices = @transform_3, window_bounds = array<i64: 1, 128>}, {pipeline_mode = #tpu.pipeline_mode<synchronous>, transform_indices = @transform_4, window_bounds = array<i64: 16, 27>}, {pipeline_mode = #tpu.pipeline_mode<synchronous>, transform_indices = @transform_5, window_bounds = array<i64: 1, 16>}, {pipeline_mode = #tpu.pipeline_mode<synchronous>, transform_indices = @transform_6, window_bounds = array<i64: 128, 16>}, {pipeline_mode = #tpu.pipeline_mode<synchronous>, transform_indices = @transform_7, window_bounds = array<i64: 1, 128>}, {pipeline_mode = #tpu.pipeline_mode<synchronous>, transform_indices = @transform_8, window_bounds = array<i64: 16, 27>}, {pipeline_mode = #tpu.pipeline_mode<synchronous>, transform_indices = @transform_9, window_bounds = array<i64: 1, 16>}, {pipeline_mode = #tpu.pipeline_mode<synchronous>, transform_indices = @transform_10, window_bounds = array<i64: 128, 16>}, {pipeline_mode = #tpu.pipeline_mode<synchronous>, transform_indices = @transform_11, window_bounds = array<i64: 1, 128>}]} {
    %c0 = arith.constant 0 : index
    %c0_0 = arith.constant 0 : index
    %0 = vector.load %arg5[%c0, %c0_0] : memref<16x27xf32, #tpu.memory_space<vmem>>, vector<16x27xf32>
    %cst = arith.constant 9.990000e-01 : f32
    %1 = vector.broadcast %cst : f32 to vector<16x27xf32>
    %2 = arith.mulf %1, %0 : vector<16x27xf32>
    %c0_1 = arith.constant 0 : index
    %c0_2 = arith.constant 0 : index
    %3 = vector.load %arg1[%c0_1, %c0_2] : memref<16x27xf32, #tpu.memory_space<vmem>>, vector<16x27xf32>
    %cst_3 = arith.constant 1.000000e-03 : f32
    %4 = vector.broadcast %cst_3 : f32 to vector<16x27xf32>
    %5 = arith.mulf %4, %3 : vector<16x27xf32>
    %6 = arith.addf %2, %5 : vector<16x27xf32>
    %c0_4 = arith.constant 0 : index
    %c0_5 = arith.constant 0 : index
    %7 = vector.load %arg9[%c0_4, %c0_5] : memref<16x27xf32, #tpu.memory_space<vmem>>, vector<16x27xf32>
    tpu.vector_store %arg9[%c0_4, %c0_5], %6 {strides = array<i32>} : memref<16x27xf32, #tpu.memory_space<vmem>>, vector<16x27xf32>,
    %c0_6 = arith.constant 0 : index
    %c0_7 = arith.constant 0 : index
    %8 = vector.load %arg6[%c0_6, %c0_7] : memref<1x16xf32, #tpu.memory_space<vmem>>, vector<1x16xf32>
    %cst_8 = arith.constant 9.990000e-01 : f32
    %9 = vector.broadcast %cst_8 : f32 to vector<1x16xf32>
    %10 = arith.mulf %9, %8 : vector<1x16xf32>
    %c0_9 = arith.constant 0 : index
    %c0_10 = arith.constant 0 : index
    %11 = vector.load %arg2[%c0_9, %c0_10] : memref<1x16xf32, #tpu.memory_space<vmem>>, vector<1x16xf32>
    %cst_11 = arith.constant 1.000000e-03 : f32
    %12 = vector.broadcast %cst_11 : f32 to vector<1x16xf32>
    %13 = arith.mulf %12, %11 : vector<1x16xf32>
    %14 = arith.addf %10, %13 : vector<1x16xf32>
    %c0_12 = arith.constant 0 : index
    %c0_13 = arith.constant 0 : index
    %15 = vector.load %arg10[%c0_12, %c0_13] : memref<1x16xf32, #tpu.memory_space<vmem>>, vector<1x16xf32>
    tpu.vector_store %arg10[%c0_12, %c0_13], %14 {strides = array<i32>} : memref<1x16xf32, #tpu.memory_space<vmem>>, vector<1x16xf32>,
    %c0_14 = arith.constant 0 : index
    %c0_15 = arith.constant 0 : index
    %16 = vector.load %arg7[%c0_14, %c0_15] : memref<128x16xf32, #tpu.memory_space<vmem>>, vector<128x16xf32>
    %cst_16 = arith.constant 9.990000e-01 : f32
    %17 = vector.broadcast %cst_16 : f32 to vector<128x16xf32>
    %18 = arith.mulf %17, %16 : vector<128x16xf32>
    %c0_17 = arith.constant 0 : index
    %c0_18 = arith.constant 0 : index
    %19 = vector.load %arg3[%c0_17, %c0_18] : memref<128x16xf32, #tpu.memory_space<vmem>>, vector<128x16xf32>
    %cst_19 = arith.constant 1.000000e-03 : f32
    %20 = vector.broadcast %cst_19 : f32 to vector<128x16xf32>
    %21 = arith.mulf %20, %19 : vector<128x16xf32>
    %22 = arith.addf %18, %21 : vector<128x16xf32>
    %c0_20 = arith.constant 0 : index
    %c0_21 = arith.constant 0 : index
    %23 = vector.load %arg11[%c0_20, %c0_21] : memref<128x16xf32, #tpu.memory_space<vmem>>, vector<128x16xf32>
    tpu.vector_store %arg11[%c0_20, %c0_21], %22 {strides = array<i32>} : memref<128x16xf32, #tpu.memory_space<vmem>>, vector<128x16xf32>,
    %c0_22 = arith.constant 0 : index
    %c0_23 = arith.constant 0 : index
    %24 = vector.load %arg8[%c0_22, %c0_23] : memref<1x128xf32, #tpu.memory_space<vmem>>, vector<1x128xf32>
    %cst_24 = arith.constant 9.990000e-01 : f32
    %25 = vector.broadcast %cst_24 : f32 to vector<1x128xf32>
    %26 = arith.mulf %25, %24 : vector<1x128xf32>
    %c0_25 = arith.constant 0 : index
    %c0_26 = arith.constant 0 : index
    %27 = vector.load %arg4[%c0_25, %c0_26] : memref<1x128xf32, #tpu.memory_space<vmem>>, vector<1x128xf32>
    %cst_27 = arith.constant 1.000000e-03 : f32
    %28 = vector.broadcast %cst_27 : f32 to vector<1x128xf32>
    %29 = arith.mulf %28, %27 : vector<1x128xf32>
    %30 = arith.addf %26, %29 : vector<1x128xf32>
    %c0_28 = arith.constant 0 : index
    %c0_29 = arith.constant 0 : index
    %31 = vector.load %arg12[%c0_28, %c0_29] : memref<1x128xf32, #tpu.memory_space<vmem>>, vector<1x128xf32>
    tpu.vector_store %arg12[%c0_28, %c0_29], %30 {strides = array<i32>} : memref<1x128xf32, #tpu.memory_space<vmem>>, vector<1x128xf32>,
    return
  }
  func.func @transform_0(%arg0: i32) -> (i32, i32) {
    %c0_i32 = arith.constant 0 : i32
    %c0_i32_0 = arith.constant 0 : i32
    %c0_i32_1 = arith.constant 0 : i32
    return %c0_i32, %c0_i32_0 : i32, i32
  }
  func.func @transform_1(%arg0: i32) -> (i32, i32) {
    %c0_i32 = arith.constant 0 : i32
    %c0_i32_0 = arith.constant 0 : i32
    %c0_i32_1 = arith.constant 0 : i32
    return %c0_i32, %c0_i32_0 : i32, i32
  }
  func.func @transform_2(%arg0: i32) -> (i32, i32) {
    %c0_i32 = arith.constant 0 : i32
    %c0_i32_0 = arith.constant 0 : i32
    %c0_i32_1 = arith.constant 0 : i32
    return %c0_i32, %c0_i32_0 : i32, i32
  }
  func.func @transform_3(%arg0: i32) -> (i32, i32) {
    %c0_i32 = arith.constant 0 : i32
    %c0_i32_0 = arith.constant 0 : i32
    %c0_i32_1 = arith.constant 0 : i32
    return %c0_i32, %c0_i32_0 : i32, i32
  }
  func.func @transform_4(%arg0: i32) -> (i32, i32) {
    %c0_i32 = arith.constant 0 : i32
    %c0_i32_0 = arith.constant 0 : i32
    %c0_i32_1 = arith.constant 0 : i32
    return %c0_i32, %c0_i32_0 : i32, i32
  }
  func.func @transform_5(%arg0: i32) -> (i32, i32) {
    %c0_i32 = arith.constant 0 : i32
    %c0_i32_0 = arith.constant 0 : i32
    %c0_i32_1 = arith.constant 0 : i32
    return %c0_i32, %c0_i32_0 : i32, i32
  }
  func.func @transform_6(%arg0: i32) -> (i32, i32) {
    %c0_i32 = arith.constant 0 : i32
    %c0_i32_0 = arith.constant 0 : i32
    %c0_i32_1 = arith.constant 0 : i32
    return %c0_i32, %c0_i32_0 : i32, i32
  }
  func.func @transform_7(%arg0: i32) -> (i32, i32) {
    %c0_i32 = arith.constant 0 : i32
    %c0_i32_0 = arith.constant 0 : i32
    %c0_i32_1 = arith.constant 0 : i32
    return %c0_i32, %c0_i32_0 : i32, i32
  }
  func.func @transform_8(%arg0: i32) -> (i32, i32) {
    %c0_i32 = arith.constant 0 : i32
    %c0_i32_0 = arith.constant 0 : i32
    %c0_i32_1 = arith.constant 0 : i32
    return %c0_i32, %c0_i32_0 : i32, i32
  }
  func.func @transform_9(%arg0: i32) -> (i32, i32) {
    %c0_i32 = arith.constant 0 : i32
    %c0_i32_0 = arith.constant 0 : i32
    %c0_i32_1 = arith.constant 0 : i32
    return %c0_i32, %c0_i32_0 : i32, i32
  }
  func.func @transform_10(%arg0: i32) -> (i32, i32) {
    %c0_i32 = arith.constant 0 : i32
    %c0_i32_0 = arith.constant 0 : i32
    %c0_i32_1 = arith.constant 0 : i32
    return %c0_i32, %c0_i32_0 : i32, i32
  }
  func.func @transform_11(%arg0: i32) -> (i32, i32) {
    %c0_i32 = arith.constant 0 : i32
    %c0_i32_0 = arith.constant 0 : i32
    %c0_i32_1 = arith.constant 0 : i32
    return %c0_i32, %c0_i32_0 : i32, i32
  }
}

module attributes {stable_mosaic.version = 11 : i64} {
  func.func @_encoder_kernel(%arg0: i32, %arg1: memref<1x32x384xbf16, #tpu.memory_space<vmem>>, %arg2: memref<1x384x256xbf16, #tpu.memory_space<vmem>>, %arg3: memref<1x1x256xf32, #tpu.memory_space<vmem>>, %arg4: memref<1x256x128xbf16, #tpu.memory_space<vmem>>, %arg5: memref<1x1x128xf32, #tpu.memory_space<vmem>>, %arg6: memref<1x2x128xf32, #tpu.memory_space<vmem>>) attributes {dimension_semantics = [#tpu.dimension_semantics<parallel>], iteration_bounds = array<i64: 2>, scalar_prefetch = 0 : i64, scratch_operands = 0 : i64, tpu.core_type = #tpu.core_type<tc>, window_params = [{transform_indices = @transform_0, window_bounds = array<i64: 1, 32, 384>}, {transform_indices = @transform_1, window_bounds = array<i64: 1, 384, 256>}, {transform_indices = @transform_2, window_bounds = array<i64: 1, 1, 256>}, {transform_indices = @transform_3, window_bounds = array<i64: 1, 256, 128>}, {transform_indices = @transform_4, window_bounds = array<i64: 1, 1, 128>}, {transform_indices = @transform_5, window_bounds = array<i64: 1, 2, 128>}]} {
    %c0 = arith.constant 0 : index
    %c0_0 = arith.constant 0 : index
    %c0_1 = arith.constant 0 : index
    %0 = vector.load %arg1[%c0, %c0_0, %c0_1] : memref<1x32x384xbf16, #tpu.memory_space<vmem>>, vector<1x32x384xbf16>
    %1 = vector.shape_cast %0 : vector<1x32x384xbf16> to vector<32x384xbf16>
    %c0_2 = arith.constant 0 : index
    %c0_3 = arith.constant 0 : index
    %c0_4 = arith.constant 0 : index
    %2 = vector.load %arg2[%c0_2, %c0_3, %c0_4] : memref<1x384x256xbf16, #tpu.memory_space<vmem>>, vector<1x384x256xbf16>
    %3 = vector.shape_cast %2 : vector<1x384x256xbf16> to vector<384x256xbf16>
    %cst = arith.constant dense<0.000000e+00> : vector<32x256xf32>
    %4 = tpu.matmul %1, %3, %cst {dimension_numbers = #tpu.dot_dimension_numbers<[1], [0], [0], [1], [0, 0, 1, 1], [], []>} : vector<32x384xbf16>, vector<384x256xbf16>, vector<32x256xf32> -> vector<32x256xf32>
    %c0_5 = arith.constant 0 : index
    %c0_6 = arith.constant 0 : index
    %c0_7 = arith.constant 0 : index
    %5 = vector.load %arg3[%c0_5, %c0_6, %c0_7] : memref<1x1x256xf32, #tpu.memory_space<vmem>>, vector<1x1x256xf32>
    %6 = vector.shape_cast %5 : vector<1x1x256xf32> to vector<1x256xf32>
    %7 = vector.broadcast %6 : vector<1x256xf32> to vector<32x256xf32>
    %8 = arith.addf %4, %7 : vector<32x256xf32>
    %cst_8 = arith.constant 0.000000e+00 : f32
    %9 = vector.broadcast %cst_8 : f32 to vector<32x256xf32>
    %10 = arith.maximumf %8, %9 : vector<32x256xf32>
    %11 = vector.extract_strided_slice %10 {offsets = [0, 0], sizes = [16, 256], strides = [1, 1]} : vector<32x256xf32> to vector<16x256xf32>
    %cst_9 = arith.constant dense<0.000000e+00> : vector<256xf32>
    %12 = vector.multi_reduction <add>, %11, %cst_9 [0] : vector<16x256xf32> to vector<256xf32>
    %13 = vector.shape_cast %12 : vector<256xf32> to vector<1x256xf32>
    %14 = vector.extract_strided_slice %10 {offsets = [16, 0], sizes = [16, 256], strides = [1, 1]} : vector<32x256xf32> to vector<16x256xf32>
    %cst_10 = arith.constant dense<0.000000e+00> : vector<256xf32>
    %15 = vector.multi_reduction <add>, %14, %cst_10 [0] : vector<16x256xf32> to vector<256xf32>
    %16 = vector.shape_cast %15 : vector<256xf32> to vector<1x256xf32>
    %17 = tpu.concatenate %13, %16 in 0 : vector<1x256xf32>, vector<1x256xf32> -> vector<2x256xf32>
    %18 = arith.truncf %17 : vector<2x256xf32> to vector<2x256xbf16>
    %c0_11 = arith.constant 0 : index
    %c0_12 = arith.constant 0 : index
    %c0_13 = arith.constant 0 : index
    %19 = vector.load %arg4[%c0_11, %c0_12, %c0_13] : memref<1x256x128xbf16, #tpu.memory_space<vmem>>, vector<1x256x128xbf16>
    %20 = vector.shape_cast %19 : vector<1x256x128xbf16> to vector<256x128xbf16>
    %cst_14 = arith.constant dense<0.000000e+00> : vector<2x128xf32>
    %21 = tpu.matmul %18, %20, %cst_14 {dimension_numbers = #tpu.dot_dimension_numbers<[1], [0], [0], [1], [0, 0, 1, 1], [], []>} : vector<2x256xbf16>, vector<256x128xbf16>, vector<2x128xf32> -> vector<2x128xf32>
    %c0_15 = arith.constant 0 : index
    %c0_16 = arith.constant 0 : index
    %c0_17 = arith.constant 0 : index
    %22 = vector.load %arg5[%c0_15, %c0_16, %c0_17] : memref<1x1x128xf32, #tpu.memory_space<vmem>>, vector<1x1x128xf32>
    %23 = vector.shape_cast %22 : vector<1x1x128xf32> to vector<1x128xf32>
    %24 = vector.broadcast %23 : vector<1x128xf32> to vector<2x128xf32>
    %25 = arith.addf %21, %24 : vector<2x128xf32>
    %c0_18 = arith.constant 0 : index
    %c0_19 = arith.constant 0 : index
    %c0_20 = arith.constant 0 : index
    %26 = vector.load %arg6[%c0_18, %c0_19, %c0_20] : memref<1x2x128xf32, #tpu.memory_space<vmem>>, vector<1x2x128xf32>
    %27 = vector.shape_cast %26 : vector<1x2x128xf32> to vector<2x128xf32>
    %28 = vector.shape_cast %25 : vector<2x128xf32> to vector<1x2x128xf32>
    tpu.vector_store %arg6[%c0_18, %c0_19, %c0_20], %28 {strides = array<i32>} : memref<1x2x128xf32, #tpu.memory_space<vmem>>, vector<1x2x128xf32>,
    return
  }
  func.func @transform_0(%arg0: i32) -> (i32, i32, i32) {
    %c0_i32 = arith.constant 0 : i32
    %c0_i32_0 = arith.constant 0 : i32
    %c0_i32_1 = arith.constant 0 : i32
    return %arg0, %c0_i32, %c0_i32_0 : i32, i32, i32
  }
  func.func @transform_1(%arg0: i32) -> (i32, i32, i32) {
    %c0_i32 = arith.constant 0 : i32
    %c0_i32_0 = arith.constant 0 : i32
    %c0_i32_1 = arith.constant 0 : i32
    return %arg0, %c0_i32, %c0_i32_0 : i32, i32, i32
  }
  func.func @transform_2(%arg0: i32) -> (i32, i32, i32) {
    %c0_i32 = arith.constant 0 : i32
    %c0_i32_0 = arith.constant 0 : i32
    %c0_i32_1 = arith.constant 0 : i32
    return %arg0, %c0_i32, %c0_i32_0 : i32, i32, i32
  }
  func.func @transform_3(%arg0: i32) -> (i32, i32, i32) {
    %c0_i32 = arith.constant 0 : i32
    %c0_i32_0 = arith.constant 0 : i32
    %c0_i32_1 = arith.constant 0 : i32
    return %arg0, %c0_i32, %c0_i32_0 : i32, i32, i32
  }
  func.func @transform_4(%arg0: i32) -> (i32, i32, i32) {
    %c0_i32 = arith.constant 0 : i32
    %c0_i32_0 = arith.constant 0 : i32
    %c0_i32_1 = arith.constant 0 : i32
    return %arg0, %c0_i32, %c0_i32_0 : i32, i32, i32
  }
  func.func @transform_5(%arg0: i32) -> (i32, i32, i32) {
    %c0_i32 = arith.constant 0 : i32
    %c0_i32_0 = arith.constant 0 : i32
    %c0_i32_1 = arith.constant 0 : i32
    return %arg0, %c0_i32, %c0_i32_0 : i32, i32, i32
  }
}

module attributes {stable_mosaic.version = 11 : i64} {
  func.func @_head_kernel(%arg0: i32, %arg1: memref<2x2x128xf32, #tpu.memory_space<vmem>>, %arg2: memref<512x128xbf16, #tpu.memory_space<vmem>>, %arg3: memref<2x128xf32, #tpu.memory_space<vmem>>, %arg4: memref<2x128xf32, #tpu.memory_space<vmem>>, %arg5: memref<2x512xf32, #tpu.memory_space<vmem>>, %arg6: memref<2x128xbf16, #tpu.memory_space<vmem>>) attributes {dimension_semantics = [#tpu.dimension_semantics<arbitrary>], iteration_bounds = array<i64: 1>, scalar_prefetch = 0 : i64, scratch_operands = 1 : i64, tpu.core_type = #tpu.core_type<tc>, window_params = [{pipeline_mode = #tpu.pipeline_mode<synchronous>, transform_indices = @transform_0, window_bounds = array<i64: 2, 2, 128>}, {transform_indices = @transform_1, window_bounds = array<i64: 512, 128>}, {pipeline_mode = #tpu.pipeline_mode<synchronous>, transform_indices = @transform_2, window_bounds = array<i64: 2, 128>}, {pipeline_mode = #tpu.pipeline_mode<synchronous>, transform_indices = @transform_3, window_bounds = array<i64: 2, 128>}, {transform_indices = @transform_4, window_bounds = array<i64: 2, 512>}]} {
    %c0_i32 = arith.constant 0 : i32
    %0 = arith.cmpi eq, %arg0, %c0_i32 : i32
    %1 = arith.extui %0 : i1 to i32
    %c0_i32_0 = arith.constant 0 : i32
    %2 = arith.cmpi ne, %1, %c0_i32_0 : i32
    scf.if %2 {
      %c0_7 = arith.constant 0 : index
      %c0_8 = arith.constant 0 : index
      %c0_9 = arith.constant 0 : index
      %9 = vector.load %arg1[%c0_7, %c0_8, %c0_9] : memref<2x2x128xf32, #tpu.memory_space<vmem>>, vector<1x2x128xf32>
      %10 = vector.shape_cast %9 : vector<1x2x128xf32> to vector<2x128xf32>
      %c1 = arith.constant 1 : index
      %c0_10 = arith.constant 0 : index
      %c0_11 = arith.constant 0 : index
      %11 = vector.load %arg1[%c1, %c0_10, %c0_11] : memref<2x2x128xf32, #tpu.memory_space<vmem>>, vector<1x2x128xf32>
      %12 = vector.shape_cast %11 : vector<1x2x128xf32> to vector<2x128xf32>
      %13 = arith.mulf %10, %10 : vector<2x128xf32>
      %cst_12 = arith.constant dense<0.000000e+00> : vector<2xf32>
      %14 = vector.multi_reduction <add>, %13, %cst_12 [1] : vector<2x128xf32> to vector<2xf32>
      %15 = vector.shape_cast %14 : vector<2xf32> to vector<2x1xf32>
      %cst_13 = arith.constant 1.000000e-24 : f32
      %16 = vector.broadcast %cst_13 : f32 to vector<2x1xf32>
      %17 = arith.maximumf %15, %16 : vector<2x1xf32>
      %18 = math.rsqrt %17 : vector<2x1xf32>
      %19 = vector.broadcast %18 : vector<2x1xf32> to vector<2x128xf32>
      %20 = arith.mulf %10, %19 : vector<2x128xf32>
      %21 = arith.mulf %12, %12 : vector<2x128xf32>
      %cst_14 = arith.constant dense<0.000000e+00> : vector<2xf32>
      %22 = vector.multi_reduction <add>, %21, %cst_14 [1] : vector<2x128xf32> to vector<2xf32>
      %23 = vector.shape_cast %22 : vector<2xf32> to vector<2x1xf32>
      %cst_15 = arith.constant 1.000000e-24 : f32
      %24 = vector.broadcast %cst_15 : f32 to vector<2x1xf32>
      %25 = arith.maximumf %23, %24 : vector<2x1xf32>
      %26 = math.rsqrt %25 : vector<2x1xf32>
      %27 = vector.broadcast %26 : vector<2x1xf32> to vector<2x128xf32>
      %28 = arith.mulf %12, %27 : vector<2x128xf32>
      %29 = arith.truncf %20 : vector<2x128xf32> to vector<2x128xbf16>
      %c0_16 = arith.constant 0 : index
      %c0_17 = arith.constant 0 : index
      %30 = vector.load %arg6[%c0_16, %c0_17] : memref<2x128xbf16, #tpu.memory_space<vmem>>, vector<2x128xbf16>
      tpu.vector_store %arg6[%c0_16, %c0_17], %29 {strides = array<i32>} : memref<2x128xbf16, #tpu.memory_space<vmem>>, vector<2x128xbf16>,
      %c0_18 = arith.constant 0 : index
      %c0_19 = arith.constant 0 : index
      %31 = vector.load %arg3[%c0_18, %c0_19] : memref<2x128xf32, #tpu.memory_space<vmem>>, vector<2x128xf32>
      tpu.vector_store %arg3[%c0_18, %c0_19], %28 {strides = array<i32>} : memref<2x128xf32, #tpu.memory_space<vmem>>, vector<2x128xf32>,
      %32 = arith.mulf %20, %28 : vector<2x128xf32>
      %cst_20 = arith.constant dense<0.000000e+00> : vector<2xf32>
      %33 = vector.multi_reduction <add>, %32, %cst_20 [1] : vector<2x128xf32> to vector<2xf32>
      %34 = vector.shape_cast %33 : vector<2xf32> to vector<2x1xf32>
      %cst_21 = arith.constant 14.2857141 : f32
      %35 = vector.broadcast %cst_21 : f32 to vector<2x1xf32>
      %36 = arith.mulf %34, %35 : vector<2x1xf32>
      %37 = vector.shape_cast %36 : vector<2x1xf32> to vector<2x1xf32>
      %38 = vector.broadcast %37 : vector<2x1xf32> to vector<2x128xf32>
      %c0_22 = arith.constant 0 : index
      %c0_23 = arith.constant 0 : index
      %39 = vector.load %arg4[%c0_22, %c0_23] : memref<2x128xf32, #tpu.memory_space<vmem>>, vector<2x128xf32>
      tpu.vector_store %arg4[%c0_22, %c0_23], %38 {strides = array<i32>} : memref<2x128xf32, #tpu.memory_space<vmem>>, vector<2x128xf32>,
    } else {
    }
    %c0 = arith.constant 0 : index
    %c0_1 = arith.constant 0 : index
    %3 = vector.load %arg6[%c0, %c0_1] : memref<2x128xbf16, #tpu.memory_space<vmem>>, vector<2x128xbf16>
    %c0_2 = arith.constant 0 : index
    %c0_3 = arith.constant 0 : index
    %4 = vector.load %arg2[%c0_2, %c0_3] : memref<512x128xbf16, #tpu.memory_space<vmem>>, vector<512x128xbf16>
    %cst = arith.constant dense<0.000000e+00> : vector<2x512xf32>
    %5 = tpu.matmul %3, %4, %cst {dimension_numbers = #tpu.dot_dimension_numbers<[1], [1], [0], [0], [0, 0, 1, 0], [], []>} : vector<2x128xbf16>, vector<512x128xbf16>, vector<2x512xf32> -> vector<2x512xf32>
    %cst_4 = arith.constant 14.2857141 : f32
    %6 = vector.broadcast %cst_4 : f32 to vector<2x512xf32>
    %7 = arith.mulf %5, %6 : vector<2x512xf32>
    %c0_5 = arith.constant 0 : index
    %c0_6 = arith.constant 0 : index
    %8 = vector.load %arg5[%c0_5, %c0_6] : memref<2x512xf32, #tpu.memory_space<vmem>>, vector<2x512xf32>
    tpu.vector_store %arg5[%c0_5, %c0_6], %7 {strides = array<i32>} : memref<2x512xf32, #tpu.memory_space<vmem>>, vector<2x512xf32>,
    return
  }
  func.func @transform_0(%arg0: i32) -> (i32, i32, i32) {
    %c0_i32 = arith.constant 0 : i32
    %c0_i32_0 = arith.constant 0 : i32
    %c0_i32_1 = arith.constant 0 : i32
    %c0_i32_2 = arith.constant 0 : i32
    return %c0_i32, %c0_i32_0, %c0_i32_1 : i32, i32, i32
  }
  func.func @transform_1(%arg0: i32) -> (i32, i32) {
    %c0_i32 = arith.constant 0 : i32
    %c0_i32_0 = arith.constant 0 : i32
    return %arg0, %c0_i32 : i32, i32
  }
  func.func @transform_2(%arg0: i32) -> (i32, i32) {
    %c0_i32 = arith.constant 0 : i32
    %c0_i32_0 = arith.constant 0 : i32
    %c0_i32_1 = arith.constant 0 : i32
    return %c0_i32, %c0_i32_0 : i32, i32
  }
  func.func @transform_3(%arg0: i32) -> (i32, i32) {
    %c0_i32 = arith.constant 0 : i32
    %c0_i32_0 = arith.constant 0 : i32
    %c0_i32_1 = arith.constant 0 : i32
    return %c0_i32, %c0_i32_0 : i32, i32
  }
  func.func @transform_4(%arg0: i32) -> (i32, i32) {
    %c0_i32 = arith.constant 0 : i32
    %c0_i32_0 = arith.constant 0 : i32
    return %c0_i32, %arg0 : i32, i32
  }
}

</mosaic_0001>

<bundles_post_ra>
// kernel: moco_forward.3
= control target key start
LH: loop header
LB: loop body
LE: loop exit
PB: predicated region body
PF: predicated region fallthrough
CT: control target
= control target key end

     0   :  { %vm43_vm0 = vcmask 220160   ;;  %vm51_vm1 = vcmask 122880   ;;  %vm133_vm2 = vcmask 130048   ;;  %s431_s0 = inlined_call_operand.vmem [shape: f32[16,27], index: 0, kind: input, shape index: {}]   ;;  %s432_s4 = inlined_call_operand.vmem [shape: f32[16,27], index: 4, kind: input, shape index: {}, may-alias: {4,8}]   ;;  %s433_s1 = inlined_call_operand.vmem [shape: f32[1,16], index: 1, kind: input, shape index: {}]   ;;  %s434_s5 = inlined_call_operand.vmem [shape: f32[1,16], index: 5, kind: input, shape index: {}, may-alias: {5,9}]   ;;  %s435_s2 = inlined_call_operand.vmem [shape: f32[128,16], index: 2, kind: input, shape index: {}]   ;;  %s436_s6 = inlined_call_operand.vmem [shape: f32[128,16], index: 6, kind: input, shape index: {}, may-alias: {6,10}]   ;;  %s437_s8 = inlined_call_operand.vmem [shape: f32[16,27], index: 8, kind: output, shape index: {0}, may-alias: {4,8}]   ;;  %s438_s9 = inlined_call_operand.vmem [shape: f32[1,16], index: 9, kind: output, shape index: {1}, may-alias: {5,9}]   ;;  %s439_s10 = inlined_call_operand.vmem [shape: f32[128,16], index: 10, kind: output, shape index: {2}, may-alias: {6,10}]   ;;  %s440_s3 = inlined_call_operand.vmem [shape: f32[1,128], index: 3, kind: input, shape index: {}]   ;;  %s441_s7 = inlined_call_operand.vmem [shape: f32[1,128], index: 7, kind: input, shape index: {}, may-alias: {7,11}]   ;;  %s442_s11 = inlined_call_operand.vmem [shape: f32[1,128], index: 11, kind: output, shape index: {3}, may-alias: {7,11}]  }
   0x1   :  { %v33_v0 = vld [vmem:[%s432_s4] sm:$0xff]  ;;  %v34_v2 = vld [vmem:[%s432_s4 + $0x8] sm:$0xff]  ;;  %v55_v21 = vld [vmem:[%s436_s6 + $0x10] sm:$0xff] }
   0x2   :  { %v37_v1 = vld [vmem:[%s431_s0] sm:$0xff]  ;;  %v35_v3 = vmul.f32 0.999, %v33_v0  ;;  %v36_v5 = vmul.f32 0.999, %v34_v2  ;;  %v38_v6 = vld [vmem:[%s431_s0 + $0x8] sm:$0xff] }
   0x3   :  { %v39_v4 = vmul.f32 0.001, %v37_v1  ;;  %v46_v7 = vld [vmem:[%s434_s5] sm:$0x1]  ;;  %v40_v10 = vmul.f32 0.001, %v38_v6 }
   0x4   :  { %v48_v8 = vld [vmem:[%s433_s1] sm:$0x1]  ;;  %v47_v11 = vmul.f32 0.999, %v46_v7  ;;  %v54_v15 = vld [vmem:[%s436_s6 + $0x8] sm:$0xff]  ;;  %v87_v26 = vld [vmem:[%s435_s2 + $0x10] sm:$0xff] }
   0x5   :  { %v41_v9 = vadd.f32 %v39_v4, %v35_v3  ;;  %v49_v12 = vmul.f32 0.001, %v48_v8  ;;  %v53_v13 = vld [vmem:[%s436_s6] sm:$0xff]  ;;  %v42_v16 = vadd.f32 %v40_v10, %v36_v5  ;;  %v86_v20 = vld [vmem:[%s435_s2 + $0x8] sm:$0xff]  ;;  %v70_v22 = vmul.f32 0.999, %v54_v15 }
   0x6   :  { %v85_v14 = vld [vmem:[%s435_s2] sm:$0xff]  ;;  %v69_v18 = vmul.f32 0.999, %v53_v13  ;;  %v102_v23 = vmul.f32 0.001, %v86_v20  ;;  %v56_v27 = vld [vmem:[%s436_s6 + $0x18] sm:$0xff] }
   0x7   :  { %44 = vst.msk [vmem:[%s437_s8] sm:$0xff] %vm43_vm0, %v41_v9  ;;  %v50_v17 = vadd.f32 %v49_v12, %v47_v11  ;;  %v101_v19 = vmul.f32 0.001, %v85_v14  ;;  %v71_v24 = vmul.f32 0.999, %v55_v21  ;;  %45 = vst.msk [vmem:[%s437_s8 + $0x8] sm:$0xff] %vm43_vm0, %v42_v16 }
   0x8   :  { %v88_v28 = vld [vmem:[%s435_s2 + $0x18] sm:$0xff]  ;;  %v118_v29 = vadd.f32 %v102_v23, %v70_v22  ;;  %v103_v30 = vmul.f32 0.001, %v87_v26  ;;  %v72_v31 = vmul.f32 0.999, %v56_v27  ;;  %v89_v34 = vld [vmem:[%s435_s2 + $0x20] sm:$0xff] }
   0x9   :  { %52 = vst.msk [vmem:[%s438_s9] sm:$0x1] %vm51_vm1, %v50_v17  ;;  %v117_v25 = vadd.f32 %v101_v19, %v69_v18  ;;  %v104_v32 = vmul.f32 0.001, %v88_v28  ;;  %v105_v39 = vmul.f32 0.001, %v89_v34 }
   0xa   :  { %v119_v36 = vadd.f32 %v103_v30, %v71_v24  ;;  %v90_v40 = vld [vmem:[%s435_s2 + $0x28] sm:$0xff]  ;;  %v91_v46 = vld [vmem:[%s435_s2 + $0x30] sm:$0xff]  ;;  %v92_v48 = vld [vmem:[%s435_s2 + $0x38] sm:$0xff] }
   0xb   :  { %134 = vst.msk [vmem:[%s439_s10] sm:$0xff] %vm133_vm2, %v117_v25  ;;  %v120_v37 = vadd.f32 %v104_v32, %v72_v31  ;;  %v106_v43 = vmul.f32 0.001, %v90_v40  ;;  %v107_v50 = vmul.f32 0.001, %v91_v46  ;;  %v93_v54 = vld [vmem:[%s435_s2 + $0x40] sm:$0xff] }
   0xc   :  { %v108_v52 = vmul.f32 0.001, %v92_v48  ;;  %v109_v59 = vmul.f32 0.001, %v93_v54  ;;  %v94_v60 = vld [vmem:[%s435_s2 + $0x48] sm:$0xff]  ;;  %v95_v2 = vld [vmem:[%s435_s2 + $0x50] sm:$0xff] }
   0xd   :  { %v110_v63 = vmul.f32 0.001, %v94_v60  ;;  %v96_v4 = vld [vmem:[%s435_s2 + $0x58] sm:$0xff]  ;;  %v111_v6 = vmul.f32 0.001, %v95_v2  ;;  %v97_v10 = vld [vmem:[%s435_s2 + $0x60] sm:$0xff] }
   0xe   :  { %v112_v8 = vmul.f32 0.001, %v96_v4  ;;  %v113_v15 = vmul.f32 0.001, %v97_v10  ;;  %v98_v16 = vld [vmem:[%s435_s2 + $0x68] sm:$0xff]  ;;  %v99_v22 = vld [vmem:[%s435_s2 + $0x70] sm:$0xff] }
   0xf   :  { %v114_v19 = vmul.f32 0.001, %v98_v16  ;;  %v100_v24 = vld [vmem:[%s435_s2 + $0x78] sm:$0xff]  ;;  %v115_v26 = vmul.f32 0.001, %v99_v22 }
  0x10   :  { %v116_v28 = vmul.f32 0.001, %v100_v24  ;;  %v152_v30 = vld [vmem:[%s440_s3] sm:$0x1] }
  0x11   :  { %v153_v34 = vmul.f32 0.001, %v152_v30 }
  0x12   :  { %v57_v33 = vld [vmem:[%s436_s6 + $0x20] sm:$0xff]  ;;  %v58_v35 = vld [vmem:[%s436_s6 + $0x28] sm:$0xff] }
  0x13   :  { %135 = vst.msk [vmem:[%s439_s10 + $0x8] sm:$0xff] %vm133_vm2, %v118_v29  ;;  %v73_v38 = vmul.f32 0.999, %v57_v33  ;;  %v74_v42 = vmul.f32 0.999, %v58_v35 }
  0x14   :  { %v150_v29 = vld [vmem:[%s441_s7] sm:$0x1] }
  0x15   :  { %v121_v45 = vadd.f32 %v105_v39, %v73_v38  ;;  %v122_v49 = vadd.f32 %v106_v43, %v74_v42  ;;  %v151_v33 = vmul.f32 0.999, %v150_v29 }
  0x17   :  { %v154_v35 = vadd.f32 %v153_v34, %v151_v33 }
  0x19   :  { %155 = vst [vmem:[%s442_s11] sm:$0x1] %v154_v35 }
  0x1a   :  { %v59_v41 = vld [vmem:[%s436_s6 + $0x30] sm:$0xff] }
  0x1b   :  { %v75_v44 = vmul.f32 0.999, %v59_v41  ;;  %136 = vst.msk [vmem:[%s439_s10 + $0x10] sm:$0xff] %vm133_vm2, %v119_v36  ;;  %137 = vst.msk [vmem:[%s439_s10 + $0x18] sm:$0xff] %vm133_vm2, %v120_v37 }
  0x1d   :  { %v123_v56 = vadd.f32 %v107_v50, %v75_v44 }
  0x22   :  { %v60_v47 = vld [vmem:[%s436_s6 + $0x38] sm:$0xff] }
  0x23   :  { %v76_v51 = vmul.f32 0.999, %v60_v47  ;;  %138 = vst.msk [vmem:[%s439_s10 + $0x20] sm:$0xff] %vm133_vm2, %v121_v45 }
  0x25   :  { %v124_v57 = vadd.f32 %v108_v52, %v76_v51 }
  0x2a   :  { %v61_v53 = vld [vmem:[%s436_s6 + $0x40] sm:$0xff]  ;;  %v62_v55 = vld [vmem:[%s436_s6 + $0x48] sm:$0xff] }
  0x2b   :  { %139 = vst.msk [vmem:[%s439_s10 + $0x28] sm:$0xff] %vm133_vm2, %v122_v49  ;;  %v77_v58 = vmul.f32 0.999, %v61_v53  ;;  %v78_v62 = vmul.f32 0.999, %v62_v55 }
  0x2d   :  { %v125_v1 = vadd.f32 %v109_v59, %v77_v58  ;;  %v126_v5 = vadd.f32 %v110_v63, %v78_v62 }
  0x32   :  { %v63_v61 = vld [vmem:[%s436_s6 + $0x50] sm:$0xff] }
  0x33   :  { %v79_v0 = vmul.f32 0.999, %v63_v61  ;;  %140 = vst.msk [vmem:[%s439_s10 + $0x30] sm:$0xff] %vm133_vm2, %v123_v56  ;;  %141 = vst.msk [vmem:[%s439_s10 + $0x38] sm:$0xff] %vm133_vm2, %v124_v57 }
  0x35   :  { %v127_v12 = vadd.f32 %v111_v6, %v79_v0 }
  0x3a   :  { %v64_v3 = vld [vmem:[%s436_s6 + $0x58] sm:$0xff] }
  0x3b   :  { %v80_v7 = vmul.f32 0.999, %v64_v3  ;;  %142 = vst.msk [vmem:[%s439_s10 + $0x40] sm:$0xff] %vm133_vm2, %v125_v1 }
  0x3d   :  { %v128_v13 = vadd.f32 %v112_v8, %v80_v7 }
  0x42   :  { %v65_v9 = vld [vmem:[%s436_s6 + $0x60] sm:$0xff]  ;;  %v66_v11 = vld [vmem:[%s436_s6 + $0x68] sm:$0xff] }
  0x43   :  { %143 = vst.msk [vmem:[%s439_s10 + $0x48] sm:$0xff] %vm133_vm2, %v126_v5  ;;  %v81_v14 = vmul.f32 0.999, %v65_v9  ;;  %v82_v18 = vmul.f32 0.999, %v66_v11 }
  0x45   :  { %v129_v21 = vadd.f32 %v113_v15, %v81_v14  ;;  %v130_v25 = vadd.f32 %v114_v19, %v82_v18 }
  0x4a   :  { %v67_v17 = vld [vmem:[%s436_s6 + $0x70] sm:$0xff] }
  0x4b   :  { %v83_v20 = vmul.f32 0.999, %v67_v17  ;;  %144 = vst.msk [vmem:[%s439_s10 + $0x50] sm:$0xff] %vm133_vm2, %v127_v12  ;;  %145 = vst.msk [vmem:[%s439_s10 + $0x58] sm:$0xff] %vm133_vm2, %v128_v13 }
  0x4d   :  { %v131_v31 = vadd.f32 %v115_v26, %v83_v20 }
  0x52   :  { %v68_v23 = vld [vmem:[%s436_s6 + $0x78] sm:$0xff] }
  0x53   :  { %v84_v27 = vmul.f32 0.999, %v68_v23  ;;  %146 = vst.msk [vmem:[%s439_s10 + $0x60] sm:$0xff] %vm133_vm2, %v129_v21  ;;  %147 = vst.msk [vmem:[%s439_s10 + $0x68] sm:$0xff] %vm133_vm2, %v130_v25 }
  0x54   :  { %148 = vst.msk [vmem:[%s439_s10 + $0x70] sm:$0xff] %vm133_vm2, %v131_v31 }
  0x55   :  { %v132_v32 = vadd.f32 %v116_v28, %v84_v27 }
  0x57   :  { %149 = vst.msk [vmem:[%s439_s10 + $0x78] sm:$0xff] %vm133_vm2, %v132_v32 }

// kernel: tile.13
= control target key start
LH: loop header
LB: loop body
LE: loop exit
PB: predicated region body
PF: predicated region fallthrough
CT: control target
= control target key end

     0   :  { %s28_s0 = inlined_call_operand.vmem [shape: f32[16], index: 0, kind: input, shape index: {}]   ;;  %s29_s1 = inlined_call_operand.vmem [shape: f32[16,16], index: 1, kind: output, shape index: {}]  }
   0x1   :  { %v4_v0 = vld [vmem:[%s28_s0] ss:$0 sm:$0xff] }
   0x2   :  { %5 = vst [vmem:[%s29_s1] sm:$0xff] %v4_v0  ;;  %8 = vst [vmem:[%s29_s1 + $0x8] sm:$0xff] %v4_v0 }

// kernel: tile.15
= control target key start
LH: loop header
LB: loop body
LE: loop exit
PB: predicated region body
PF: predicated region fallthrough
CT: control target
= control target key end

     0   :  { %s7_s6 = smov 3  ;;  %s21_s9 = smov 3  ;;  %vm4_vm0 = vcmask 130048   ;;  %vm11_vm1 = vcmask 1048448   ;;  %vm18_vm2 = vcmask 917248   ;;  %vm25_vm3 = vcmask 786048   ;;  %s131_s0 = inlined_call_operand.vmem [shape: f32[16,16], index: 0, kind: input, shape index: {}]   ;;  %s132_s1 = inlined_call_operand.vmem [shape: f32[1,1,256], index: 1, kind: output, shape index: {}]  }
   0x1   :  { %v69_v0 = vld [vmem:[%s131_s0 + $0x7] ss:$8 sm:%s7_s6]   ;;  %s84_s10 = smov 112   ;;  %v71_v1 = vld [vmem:[%s131_s0 + $0x5] ss:$8 sm:%s21_s9]   ;;  %s14_s13 = smov 3 }
   0x2   :  { %9 = vrot.lane.b32.xlu0 %v69_v0, %s84_s10  ;;  %s85_s14 = smov 80   ;;  %v70_v2 = vld [vmem:[%s131_s0 + $0x6] ss:$8 sm:%s14_s13]   ;;  %s28_s17 = smov 3  ;;  %vm32_vm4 = vcmask 654848   ;;  %vm39_vm5 = vcmask 523648  }
   0x3   :  { %23 = vrot.lane.b32.xlu1 %v71_v1, %s85_s14  ;;  %v72_v3 = vld [vmem:[%s131_s0 + $0x4] ss:$8 sm:%s28_s17]   ;;  %s35_s20 = smov 3  ;;  %s42_s21 = smov 3  ;;  %vm46_vm6 = vcmask 392448   ;;  %vm53_vm7 = vcmask 261248  }
   0x4   :  { %s86_s22 = smov 96   ;;  %s87_s23 = smov 64   ;;  %v73_v4 = vld [vmem:[%s131_s0 + $0x3] ss:$8 sm:%s35_s20]   ;;  %v74_v5 = vld [vmem:[%s131_s0 + $0x2] ss:$8 sm:%s42_s21]  }
   0x5   :  { %s2_s26 = smov 3  ;;  %s49_s29 = smov 3 }
   0x6   :  { %16 = vrot.lane.b32.xlu0 %v70_v2, %s86_s22  ;;  %v3_v6 = vld [vmem:[%s131_s0] ss:$8 sm:%s2_s26]   ;;  %s88_s3 = smov 48   ;;  %s89_s4 = smov 32  }
   0x7   :  { %30 = vrot.lane.b32.xlu1 %v72_v3, %s87_s23  ;;  %5 = vst.msk [vmem:[#allocation0] ss:$8 sm:$0x3] %vm4_vm0, %v3_v6   ;;  %v75_v7 = vld [vmem:[%s131_s0 + $0x1] ss:$8 sm:%s49_s29]   ;;  %s90_s0 = smov 16  }
   0xa   :  { %37 = vrot.lane.b32.xlu0 %v73_v4, %s88_s3 }
   0xb   :  { %44 = vrot.lane.b32.xlu1 %v74_v5, %s89_s4 }
   0xe   :  { %51 = vrot.lane.b32.xlu0 %v75_v7, %s90_s0 }
  0x74   :  { %v10_v8 = vpop.permute.xlu0 %9  }
  0x75   :  { %12 = vst.msk [vmem:[#allocation0] ss:$8 sm:$0x3] %vm11_vm1, %v10_v8   ;;  %v24_v9 = vpop.permute.xlu1 %23  }
  0x78   :  { %v17_v10 = vpop.permute.xlu0 %16  }
  0x79   :  { %19 = vst.msk [vmem:[#allocation0] ss:$8 sm:$0x3] %vm18_vm2, %v17_v10   ;;  %v31_v11 = vpop.permute.xlu1 %30  }
  0x7a   :  { %26 = vst.msk [vmem:[#allocation0] ss:$8 sm:$0x3] %vm25_vm3, %v24_v9  }
  0x7b   :  { %33 = vst.msk [vmem:[#allocation0] ss:$8 sm:$0x3] %vm32_vm4, %v31_v11  }
  0x7c   :  { %v38_v12 = vpop.permute.xlu0 %37  }
  0x7d   :  { %40 = vst.msk [vmem:[#allocation0] ss:$8 sm:$0x3] %vm39_vm5, %v38_v12   ;;  %v45_v13 = vpop.permute.xlu1 %44  }
  0x7e   :  { %47 = vst.msk [vmem:[#allocation0] ss:$8 sm:$0x3] %vm46_vm6, %v45_v13  }
  0x80   :  { %v52_v14 = vpop.permute.xlu0 %51  }
  0x81   :  { %54 = vst.msk [vmem:[#allocation0] ss:$8 sm:$0x3] %vm53_vm7, %v52_v14  }
  0x88   :  { %v59_v15 = vld [vmem:[#allocation0] sm:$0x1]  ;;  %v64_v16 = vld [vmem:[#allocation0 + $0x8] sm:$0x1] }
  0x89   :  { %62 = vst [vmem:[%s132_s1] sm:$0x1] %v59_v15  ;;  %76 = vst [vmem:[%s132_s1 + $0x1] sm:$0x1] %v64_v16 }

// kernel: moco_forward.5
= control target key start
LH: loop header
LB: loop body
LE: loop exit
PB: predicated region body
PF: predicated region fallthrough
CT: control target
= control target key end

     0   :  { %vm23_vm0 = vcmask 1041408   ;;  %v530_v52 = vmov 1983009808   ;;  %v398_v54 = vlaneseq  ;;  %s680_s0 = inlined_call_operand.vmem [shape: f32[2,2,128], index: 0, kind: input, shape index: {}]   ;;  %s681_s1 = inlined_call_operand.vmem [shape: bf16[512,128], index: 1, kind: input, shape index: {}]   ;;  %s682_s2 = inlined_call_operand.vmem [shape: f32[2,128], index: 2, kind: output, shape index: {0}]   ;;  %s683_s3 = inlined_call_operand.vmem [shape: f32[2,128], index: 3, kind: output, shape index: {1}]   ;;  %s684_s4 = inlined_call_operand.vmem [shape: f32[2,512], index: 4, kind: output, shape index: {2}]  }
   0x1   :  { %v559_v0 = vld [vmem:[%s680_s0] sm:$0x3]  ;;  %v564_v1 = vld [vmem:[%s680_s0 + $0x2] sm:$0x3]  ;;  %v494_v4 = vld [vmem:[%s681_s1 + $0x78] sm:$0xff]   ;;  %v396_v53 = vunpack.c.l.s4 %v530_v52 }
   0x2   :  { %v22_v2 = vmul.f32 %v559_v0, %v559_v0  ;;  %v30_v3 = vmul.f32 %v564_v1, %v564_v1  ;;  %v495_v5 = vld [vmem:[%s681_s1 + $0xf8] sm:$0xff]   ;;  %457 = vmatprep.subr.bf16.mxu0 %v494_v4  ;;  %v498_v10 = vld [vmem:[%s681_s1 + $0x70] sm:$0xff]   ;;  %v502_v14 = vld [vmem:[%s681_s1 + $0x68] sm:$0xff]   ;;  %v399_v56 = vshrl.u32 %v398_v54, 7 }
   0x3   :  { %v496_v7 = vld [vmem:[%s681_s1 + $0x38] sm:$0xff]   ;;  %475 = vmatprep.subr.bf16.mxu1 %v495_v5  ;;  %v499_v11 = vld [vmem:[%s681_s1 + $0xf0] sm:$0xff]   ;;  %v503_v15 = vld [vmem:[%s681_s1 + $0xe8] sm:$0xff]   ;;  %v397_v55 = vunpack.c.0.s8 %v396_v53 }
   0x4   :  { %v24_v6 = vsel %vm23_vm0, %v22_v2, 0.0  ;;  %v497_v8 = vld [vmem:[%s681_s1 + $0xb8] sm:$0xff]   ;;  %v31_v9 = vsel %vm23_vm0, %v30_v3, 0.0  ;;  %458 = vmatpush3.bf16.xpose.msra.mxu0 %v496_v7  ;;  %v500_v12 = vld [vmem:[%s681_s1 + $0x30] sm:$0xff]   ;;  %v504_v16 = vld [vmem:[%s681_s1 + $0x28] sm:$0xff]  }
   0x5   :  { %25 = vadd.xlane.f32.xlu0 %v24_v6  ;;  %476 = vmatpush3.bf16.xpose.msra.mxu1 %v497_v8  ;;  %v501_v13 = vld [vmem:[%s681_s1 + $0xb0] sm:$0xff]   ;;  %v505_v17 = vld [vmem:[%s681_s1 + $0xa8] sm:$0xff]   ;;  %v506_v18 = vld [vmem:[%s681_s1 + $0x60] sm:$0xff]  }
   0x6   :  { %459 = vmatprep.subr.bf16.mxu0 %v498_v10  ;;  %477 = vmatprep.subr.bf16.mxu1 %v499_v11  ;;  %v507_v19 = vld [vmem:[%s681_s1 + $0xe0] sm:$0xff]   ;;  %v510_v22 = vld [vmem:[%s681_s1 + $0x58] sm:$0xff]   ;;  %v514_v26 = vld [vmem:[%s681_s1 + $0x50] sm:$0xff]  }
   0x7   :  { %v508_v20 = vld [vmem:[%s681_s1 + $0x20] sm:$0xff]   ;;  %v511_v23 = vld [vmem:[%s681_s1 + $0xd8] sm:$0xff]   ;;  %v515_v27 = vld [vmem:[%s681_s1 + $0xd0] sm:$0xff]  }
   0x8   :  { %v509_v21 = vld [vmem:[%s681_s1 + $0xa0] sm:$0xff]   ;;  %v512_v24 = vld [vmem:[%s681_s1 + $0x18] sm:$0xff]   ;;  %v516_v28 = vld [vmem:[%s681_s1 + $0x10] sm:$0xff]  }
   0x9   :  { %32 = vadd.xlane.f32.xlu0 %v31_v9  ;;  %v513_v25 = vld [vmem:[%s681_s1 + $0x98] sm:$0xff]   ;;  %v517_v29 = vld [vmem:[%s681_s1 + $0x90] sm:$0xff]   ;;  %v518_v30 = vld [vmem:[%s681_s1 + $0x48] sm:$0xff]  }
   0xa   :  { %v519_v31 = vld [vmem:[%s681_s1 + $0xc8] sm:$0xff]   ;;  %v522_v34 = vld [vmem:[%s681_s1 + $0x40] sm:$0xff]  }
   0xb   :  { %v520_v32 = vld [vmem:[%s681_s1 + $0x8] sm:$0xff]   ;;  %v523_v35 = vld [vmem:[%s681_s1 + $0xc0] sm:$0xff]  }
   0xc   :  { %460 = vmatpush3.bf16.xpose.msra.mxu0 %v500_v12  ;;  %v521_v33 = vld [vmem:[%s681_s1 + $0x88] sm:$0xff]   ;;  %v524_v36 = vld [vmem:[%s681_s1] sm:$0xff]  }
   0xd   :  { %478 = vmatpush3.bf16.xpose.msra.mxu1 %v501_v13  ;;  %461 = vmatprep.subr.bf16.mxu0 %v502_v14  ;;  %v525_v37 = vld [vmem:[%s681_s1 + $0x80] sm:$0xff]  }
   0xe   :  { %479 = vmatprep.subr.bf16.mxu1 %v503_v15 }
  0x14   :  { %462 = vmatpush3.bf16.xpose.msra.mxu0 %v504_v16 }
  0x15   :  { %480 = vmatpush3.bf16.xpose.msra.mxu1 %v505_v17  ;;  %463 = vmatprep.subr.bf16.mxu0 %v506_v18 }
  0x16   :  { %481 = vmatprep.subr.bf16.mxu1 %v507_v19 }
  0x1c   :  { %464 = vmatpush3.bf16.xpose.msra.mxu0 %v508_v20 }
  0x1d   :  { %482 = vmatpush3.bf16.xpose.msra.mxu1 %v509_v21  ;;  %465 = vmatprep.subr.bf16.mxu0 %v510_v22 }
  0x1e   :  { %483 = vmatprep.subr.bf16.mxu1 %v511_v23 }
  0x24   :  { %466 = vmatpush3.bf16.xpose.msra.mxu0 %v512_v24 }
  0x25   :  { %484 = vmatpush3.bf16.xpose.msra.mxu1 %v513_v25  ;;  %467 = vmatprep.subr.bf16.mxu0 %v514_v26 }
  0x26   :  { %485 = vmatprep.subr.bf16.mxu1 %v515_v27 }
  0x2c   :  { %468 = vmatpush3.bf16.xpose.msra.mxu0 %v516_v28 }
  0x2d   :  { %486 = vmatpush3.bf16.xpose.msra.mxu1 %v517_v29  ;;  %469 = vmatprep.subr.bf16.mxu0 %v518_v30 }
  0x2e   :  { %487 = vmatprep.subr.bf16.mxu1 %v519_v31 }
  0x34   :  { %470 = vmatpush3.bf16.xpose.msra.mxu0 %v520_v32 }
  0x35   :  { %488 = vmatpush3.bf16.xpose.msra.mxu1 %v521_v33  ;;  %471 = vmatprep.subr.bf16.mxu0 %v522_v34 }
  0x36   :  { %489 = vmatprep.subr.bf16.mxu1 %v523_v35 }
  0x3c   :  { %472 = vmatpush3.bf16.xpose.msra.mxu0 %v524_v36 }
  0x3d   :  { %490 = vmatpush3.bf16.xpose.msra.mxu1 %v525_v37 }
  0x8e   :  { %v26_v38 = vpop.xlane.xlu0 %25 }
  0x8f   :  { %v27_v39 = vmax.f32 %v26_v38, 1e-24 }
  0x91   :  { %526 = vrsqrt.f32 %v27_v39 }
  0x92   :  { %v33_v40 = vpop.xlane.xlu0 %32 }
  0x93   :  { %v34_v41 = vmax.f32 %v33_v40, 1e-24 }
  0x95   :  { %528 = vrsqrt.f32 %v34_v41 }
  0x9e   :  { %v527_v42 = vpop.eup %526 }
  0x9f   :  { %v29_v43 = vmul.f32 %v527_v42, %v559_v0  ;;  %v400_v0 = vsub.s32 %v397_v55, %v399_v56 }
  0xa1   :  { %v37_v44 = vpack.c.bf16 %v29_v43, %v29_v43 }
  0xa2   :  { %v529_v45 = vpop.eup %528 }
  0xa3   :  { %v36_v46 = vmul.f32 %v529_v45, %v564_v1  ;;  %38 = vst [vmem:[#allocation2] sm:$0x1] %v37_v44 }
  0xa5   :  { %v40_v47 = vmul.f32 %v36_v46, %v29_v43  ;;  %39 = vst [vmem:[%s682_s2] sm:$0x3] %v36_v46 }
  0xa7   :  { %v41_v48 = vsel %vm23_vm0, %v40_v47, 0.0 }
  0xa8   :  { %42 = vadd.xlane.f32.xlu1 %v41_v48 }
  0xaa   :  { %v46_v49 = vld [vmem:[#allocation2] sm:$0x1] }
  0xab   :  { %473 = vmatprep.mubr.bf16.mxu0 %v46_v49  ;;  %491 = vmatprep.mubr.bf16.mxu1 %v46_v49 }
  0xac   :  { %474 = vmatmul.mubr.bf16.vlgmr.msra.gmra.mxu0 %v46_v49  ;;  %492 = vmatmul.mubr.bf16.vlgmr.msra.gmra.mxu1 %v46_v49 }
 0x131   :  { %v43_v50 = vpop.xlane.xlu1 %42 }
 0x132   :  { %v44_v51 = vmul.f32 14.285714, %v43_v50 }
 0x134   :  { %45 = vst [vmem:[%s683_s3] sm:$0x3] %v44_v51 }
 0x16c   :  { %v337_v57 = vpop.f32.mrf.mxu0  ;;  %v378_v58 = vpop.f32.mrf.mxu1 }
 0x16d   :  { %v385_v59 = vmul.f32 14.285714, %v337_v57  ;;  %v387_v62 = vmul.f32 14.285714, %v378_v58 }
 0x16e   :  { %v339_v60 = vpop.f32.mrf.mxu0  ;;  %v380_v61 = vpop.f32.mrf.mxu1 }
 0x16f   :  { %v386_v63 = vmul.f32 14.285714, %v339_v60  ;;  %v388_v1 = vmul.f32 14.285714, %v380_v61 }
 0x170   :  { %v341_v2 = vpop.f32.mrf.mxu0  ;;  %v382_v3 = vpop.f32.mrf.mxu1 }
 0x171   :  { %v393_v4 = vcombine.low %v385_v59, %v386_v63  ;;  %v394_v5 = vcombine.low %v387_v62, %v388_v1 }
 0x172   :  { %v342_v6 = vpop.f32.mrf.mxu0  ;;  %v383_v7 = vpop.f32.mrf.mxu1 }
 0x173   :  { %v401_v8 = vrot.slane %v393_v4, %v400_v0  ;;  %v408_v9 = vrot.slane %v394_v5, %v400_v0 }
 0x175   :  { %v409_v10 = vcombine.low %v401_v8, %v408_v9 }
 0x177   :  { %411 = vst [vmem:[%s684_s4] sm:$0xff] %v409_v10 }

// kernel: moco_forward.4
= control target key start
LH: loop header
LB: loop body
LE: loop exit
PB: predicated region body
PF: predicated region fallthrough
CT: control target
= control target key end

     0   :  { %s1309_s18 = smov 0   ;;  %s1409_s0 = inlined_call_operand.vmem [shape: bf16[2,32,384], index: 0, kind: input, shape index: {}]   ;;  %s1410_s1 = inlined_call_operand.vmem [shape: bf16[2,384,256], index: 1, kind: input, shape index: {}]   ;;  %s1411_s2 = inlined_call_operand.vmem [shape: f32[2,1,256], index: 2, kind: input, shape index: {}]   ;;  %s1412_s3 = inlined_call_operand.vmem [shape: bf16[2,256,128], index: 3, kind: input, shape index: {}]   ;;  %s1413_s4 = inlined_call_operand.vmem [shape: f32[2,1,128], index: 4, kind: input, shape index: {}]   ;;  %s1414_s5 = inlined_call_operand.vmem [shape: f32[2,2,128], index: 5, kind: output, shape index: {}]  }
   0x1 LB: > { %s1056_s19 = sadd.s32 4294967295, %s1276_s18   ;;  %p1060_p0 = scmp.ge.s32.totalorder %s1276_s18, 1  ;;  %s1276_s18 = sphi %s1309_s18, %s15_s18  }
   0x2   : > { %p224_p1 = scmp.lt.s32.totalorder %s1276_s18, 3 }
   0x4   : > { %p225_p2 = pnand %p1060_p0, %p224_p1 }
   0x5   : > { %p268_p3 = scmp.lt.s32.totalorder (!%p225_p2), %s1056_s19, 1 }
   0x6   : > { %228 = sbr.rel (%p225_p2) target bundleno = 511 (0x1ff), region = 40 }
   0xb   : > { %v1278_v0 = vmov 0   ;;  %s1416_s19 = smov (!%p268_p3, %s1056_s19), 1  ;;  %vm777_vm0 = vcmask 1040384  }
   0xc   : > { %720 = vmatprep.mubr.bf16.mxu1 %v1278_v0  ;;  %s1164_s20 = smul.u32 384, %s1416_s19  ;;  %s1140_s28 = sshll.u32 %s1416_s19, 7 }
   0xd   : > { %s1163_s24 = smul.u32 48, %s1416_s19  ;;  %s286_s6 = scalar_lea.vmem %s1412_s3, %s1140_s28 }
   0xe   : > { %s1324_s23 = scalar_lea.vmem %s1410_s1, %s1164_s20  ;;  %v1254_v55 = vld [vmem:[%s286_s6 + $0x78] sm:$0xff]   ;;  %v1256_v57 = vld [vmem:[%s286_s6 + $0x70] sm:$0xff]   ;;  %v1258_v59 = vld [vmem:[%s286_s6 + $0x68] sm:$0xff]   ;;  %s1063_s7 = sshll.u32 %s1416_s19, 1 }
   0xf   : > { %v1174_v1 = vld [vmem:[%s1324_s23 + $0x74] ss:$8 sps:$4 sm:$0xff]   ;;  %v1176_v2 = vld [vmem:[%s1324_s23 + $0x70] ss:$8 sps:$4 sm:$0xff]   ;;  %v1177_v3 = vld [vmem:[%s1324_s23 + $0x64] ss:$8 sps:$4 sm:$0xff]   ;;  %s1360_s27 = scalar_lea.vmem %s1409_s0, %s1163_s24  ;;  %s281_s10 = scalar_lea.vmem %s1411_s2, %s1063_s7 }
  0x10   : > { %635 = vmatprep.subr.bf16.mxu0 %v1174_v1  ;;  %v1179_v4 = vld [vmem:[%s1324_s23 + $0x60] ss:$8 sps:$4 sm:$0xff]   ;;  %v1180_v5 = vld [vmem:[%s1324_s23 + $0x54] ss:$8 sps:$4 sm:$0xff]   ;;  %v1182_v6 = vld [vmem:[%s1324_s23 + $0x50] ss:$8 sps:$4 sm:$0xff]   ;;  %s289_s13 = scalar_lea.vmem %s1413_s4, %s1416_s19  ;;  %s293_s16 = scalar_lea.vmem %s1414_s5, %s1063_s7 }
  0x11   : > { %636 = vmatpush1.bf16.msra.mxu0 %v1176_v2  ;;  %v1183_v7 = vld [vmem:[%s1324_s23 + $0x44] ss:$8 sps:$4 sm:$0xff]   ;;  %v1185_v8 = vld [vmem:[%s1324_s23 + $0x40] ss:$8 sps:$4 sm:$0xff]   ;;  %v1197_v9 = vld [vmem:[%s1324_s23 + $0x174] ss:$8 sps:$4 sm:$0xff]  }
  0x12   : > { %637 = vmatprep.subr.bf16.mxu0 %v1177_v3  ;;  %v1200_v10 = vld [vmem:[%s1324_s23 + $0x170] ss:$8 sps:$4 sm:$0xff]   ;;  %v1186_v11 = vld [vmem:[%s1324_s23 + $0x34] ss:$8 sps:$4 sm:$0xff]   ;;  %688 = vmatprep.subr.bf16.mxu1 %v1197_v9  ;;  %v1203_v12 = vld [vmem:[%s1324_s23 + $0x164] ss:$8 sps:$4 sm:$0xff]  }
  0x13   : > { %689 = vmatpush1.bf16.msra.mxu1 %v1200_v10  ;;  %v1206_v13 = vld [vmem:[%s1324_s23 + $0x160] ss:$8 sps:$4 sm:$0xff]   ;;  %v1188_v14 = vld [vmem:[%s1324_s23 + $0x30] ss:$8 sps:$4 sm:$0xff]   ;;  %v1189_v15 = vld [vmem:[%s1324_s23 + $0x24] ss:$8 sps:$4 sm:$0xff]  }
  0x14   : > { %690 = vmatprep.subr.bf16.mxu1 %v1203_v12  ;;  %v1209_v16 = vld [vmem:[%s1324_s23 + $0x154] ss:$8 sps:$4 sm:$0xff]   ;;  %v1212_v17 = vld [vmem:[%s1324_s23 + $0x150] ss:$8 sps:$4 sm:$0xff]   ;;  %v1191_v18 = vld [vmem:[%s1324_s23 + $0x20] ss:$8 sps:$4 sm:$0xff]  }
  0x15   : > { %638 = vmatpush1.bf16.msra.mxu0 %v1179_v4  ;;  %v1215_v19 = vld [vmem:[%s1324_s23 + $0x144] ss:$8 sps:$4 sm:$0xff]   ;;  %v1192_v20 = vld [vmem:[%s1324_s23 + $0x14] ss:$8 sps:$4 sm:$0xff]   ;;  %v1194_v21 = vld [vmem:[%s1324_s23 + $0x10] ss:$8 sps:$4 sm:$0xff]  }
  0x16   : > { %639 = vmatprep.subr.bf16.mxu0 %v1180_v5  ;;  %v1218_v22 = vld [vmem:[%s1324_s23 + $0x140] ss:$8 sps:$4 sm:$0xff]   ;;  %v1221_v23 = vld [vmem:[%s1324_s23 + $0x134] ss:$8 sps:$4 sm:$0xff]   ;;  %v1195_v24 = vld [vmem:[%s1324_s23 + $0x4] ss:$8 sps:$4 sm:$0xff]  }
  0x17   : > { %691 = vmatpush1.bf16.msra.mxu1 %v1206_v13  ;;  %v1224_v25 = vld [vmem:[%s1324_s23 + $0x130] ss:$8 sps:$4 sm:$0xff]   ;;  %v1199_v26 = vld [vmem:[%s1324_s23] ss:$8 sps:$4 sm:$0xff]   ;;  %v1227_v27 = vld [vmem:[%s1324_s23 + $0x124] ss:$8 sps:$4 sm:$0xff]  }
  0x18   : > { %692 = vmatprep.subr.bf16.mxu1 %v1209_v16  ;;  %v1201_v28 = vld [vmem:[%s1324_s23 + $0xf4] ss:$8 sps:$4 sm:$0xff]   ;;  %v1205_v29 = vld [vmem:[%s1324_s23 + $0xf0] ss:$8 sps:$4 sm:$0xff]   ;;  %v1230_v30 = vld [vmem:[%s1324_s23 + $0x120] ss:$8 sps:$4 sm:$0xff]  }
  0x19   : > { %640 = vmatpush1.bf16.msra.mxu0 %v1182_v6  ;;  %v1233_v31 = vld [vmem:[%s1324_s23 + $0x114] ss:$8 sps:$4 sm:$0xff]   ;;  %v1207_v32 = vld [vmem:[%s1324_s23 + $0xe4] ss:$8 sps:$4 sm:$0xff]   ;;  %v1211_v33 = vld [vmem:[%s1324_s23 + $0xe0] ss:$8 sps:$4 sm:$0xff]  }
  0x1a   : > { %641 = vmatprep.subr.bf16.mxu0 %v1183_v7  ;;  %v1236_v34 = vld [vmem:[%s1324_s23 + $0x110] ss:$8 sps:$4 sm:$0xff]   ;;  %v1239_v36 = vld [vmem:[%s1324_s23 + $0x104] ss:$8 sps:$4 sm:$0xff]   ;;  %v1213_v37 = vld [vmem:[%s1324_s23 + $0xd4] ss:$8 sps:$4 sm:$0xff]   ;;  %v353_v7 = vlaneseq }
  0x1b   : > { %693 = vmatpush1.bf16.msra.mxu1 %v1212_v17  ;;  %v1249_v35 = vld [vmem:[%s1360_s27 + $0x4] ss:$12 sps:$4 sm:$0xff]   ;;  %v1242_v38 = vld [vmem:[%s1324_s23 + $0x100] ss:$8 sps:$4 sm:$0xff]   ;;  %v1225_v43 = vld [vmem:[%s1324_s23 + $0xb4] ss:$8 sps:$4 sm:$0xff]  }
  0x1c   : > { %694 = vmatprep.subr.bf16.mxu1 %v1215_v19  ;;  %667 = vmatprep.mubr.bf16.mxu0 %v1249_v35  ;;  %v1217_v39 = vld [vmem:[%s1324_s23 + $0xd0] ss:$8 sps:$4 sm:$0xff]   ;;  %v1219_v40 = vld [vmem:[%s1324_s23 + $0xc4] ss:$8 sps:$4 sm:$0xff]   ;;  %v1245_v41 = vld [vmem:[%s1360_s27 + $0x8] ss:$12 sps:$4 sm:$0xff]  }
  0x1d   : > { %642 = vmatpush1.bf16.msra.mxu0 %v1185_v8  ;;  %v1223_v42 = vld [vmem:[%s1324_s23 + $0xc0] ss:$8 sps:$4 sm:$0xff]   ;;  %v1229_v44 = vld [vmem:[%s1324_s23 + $0xb0] ss:$8 sps:$4 sm:$0xff]   ;;  %v1231_v45 = vld [vmem:[%s1324_s23 + $0xa4] ss:$8 sps:$4 sm:$0xff]  }
  0x1e   : > { %643 = vmatprep.subr.bf16.mxu0 %v1186_v11  ;;  %v1250_v46 = vld [vmem:[%s1360_s27 + $0x20] ss:$12 sps:$4 sm:$0xff]   ;;  %v1237_v48 = vld [vmem:[%s1324_s23 + $0x94] ss:$8 sps:$4 sm:$0xff]   ;;  %v1241_v49 = vld [vmem:[%s1324_s23 + $0x90] ss:$8 sps:$4 sm:$0xff]  }
  0x1f   : > { %695 = vmatpush1.bf16.msra.mxu1 %v1218_v22  ;;  %v1235_v47 = vld [vmem:[%s1324_s23 + $0xa0] ss:$8 sps:$4 sm:$0xff]   ;;  %v1243_v50 = vld [vmem:[%s1324_s23 + $0x84] ss:$8 sps:$4 sm:$0xff]   ;;  %v1255_v56 = vld [vmem:[%s286_s6 + $0x38] sm:$0xff]   ;;  %v354_v9 = vshrl.u32 %v353_v7, 7 }
  0x20   : > { %696 = vmatprep.subr.bf16.mxu1 %v1221_v23  ;;  %v1246_v51 = vld [vmem:[%s1324_s23 + $0x80] ss:$8 sps:$4 sm:$0xff]   ;;  %v1253_v54 = vld [vmem:[%s1360_s27 + $0x18] ss:$12 sps:$4 sm:$0xff]   ;;  %v1257_v58 = vld [vmem:[%s286_s6 + $0x30] sm:$0xff]  }
  0x21   : > { %644 = vmatpush1.bf16.msra.mxu0 %v1188_v14  ;;  %v1247_v52 = vld [vmem:[%s1360_s27] ss:$12 sps:$4 sm:$0xff]   ;;  %v1251_v53 = vld [vmem:[%s1360_s27 + $0x1c] ss:$12 sps:$4 sm:$0xff]   ;;  %v1264_v1 = vld [vmem:[%s286_s6 + $0x50] sm:$0xff]   ;;  %v355_v11 = vsub.s32 0, %v354_v9 }
  0x22   : > { %645 = vmatprep.subr.bf16.mxu0 %v1189_v15  ;;  %v1259_v60 = vld [vmem:[%s286_s6 + $0x28] sm:$0xff]   ;;  %v1260_v61 = vld [vmem:[%s286_s6 + $0x60] sm:$0xff]   ;;  %v1262_v63 = vld [vmem:[%s286_s6 + $0x58] sm:$0xff]   ;;  %v359_v13 = vsub.s32 1, %v354_v9 }
  0x23   : > { %697 = vmatpush1.bf16.msra.mxu1 %v1224_v25  ;;  %v1261_v62 = vld [vmem:[%s286_s6 + $0x20] sm:$0xff]   ;;  %v1265_v2 = vld [vmem:[%s286_s6 + $0x10] sm:$0xff]   ;;  %v1266_v3 = vld [vmem:[%s286_s6 + $0x48] sm:$0xff]  }
  0x24   : > { %698 = vmatprep.subr.bf16.mxu1 %v1227_v27  ;;  %v1267_v4 = vld [vmem:[%s286_s6 + $0x8] sm:$0xff]   ;;  %v1268_v5 = vld [vmem:[%s286_s6 + $0x40] sm:$0xff]  }
  0x25   : > { %646 = vmatpush1.bf16.msra.mxu0 %v1191_v18  ;;  %v1269_v6 = vld [vmem:[%s286_s6] sm:$0xff]  }
  0x26   : > { %647 = vmatprep.subr.bf16.mxu0 %v1192_v20  ;;  %v351_v12 = vld [vmem:[%s281_s10] sm:$0x3] }
  0x27   : > { %699 = vmatpush1.bf16.msra.mxu1 %v1230_v30  ;;  %v356_v15 = vrot.slane %v351_v12, %v355_v11  ;;  %v360_v16 = vrot.slane %v351_v12, %v359_v13 }
  0x28   : > { %700 = vmatprep.subr.bf16.mxu1 %v1233_v31 }
  0x29   : > { %648 = vmatpush1.bf16.msra.mxu0 %v1194_v21 }
  0x2a   : > { %649 = vmatprep.subr.bf16.mxu0 %v1195_v24 }
  0x2b   : > { %701 = vmatpush1.bf16.msra.mxu1 %v1236_v34 }
  0x2c   : > { %702 = vmatprep.subr.bf16.mxu1 %v1239_v36 }
  0x2d   : > { %650 = vmatpush1.bf16.msra.mxu0 %v1199_v26 }
  0x2e   : > { %651 = vmatprep.subr.bf16.mxu0 %v1201_v28 }
  0x2f   : > { %703 = vmatpush1.bf16.msra.mxu1 %v1242_v38 }
  0x30   : > { %1141 = vmatprep.subr.bf16.mxu1 %v1254_v55 }
  0x31   : > { %652 = vmatpush2.bf16.msra.mxu0 %v1205_v29 }
  0x32   : > { %653 = vmatprep.subr.bf16.mxu0 %v1207_v32  ;;  %721 = vmatmul.mubr.bf16.vlgmr.msra.gmra.mxu1 %v1245_v41 }
  0x33   : > { %730 = vmatprep.mubr.bf16.mxu1 %v1278_v0  ;;  %1142 = vmatpush3.bf16.msra.mxu1 %v1255_v56  ;;  %v1263_v0 = vld [vmem:[%s286_s6 + $0x18] sm:$0xff]  }
  0x34   : > { %1143 = vmatprep.subr.bf16.mxu1 %v1256_v57 }
  0x35   : > { %654 = vmatpush2.bf16.msra.mxu0 %v1211_v33 }
  0x36   : > { %655 = vmatprep.subr.bf16.mxu0 %v1213_v37 }
  0x37   : > { %1144 = vmatpush3.bf16.msra.mxu1 %v1257_v58 }
  0x38   : > { %1145 = vmatprep.subr.bf16.mxu1 %v1258_v59 }
  0x39   : > { %656 = vmatpush2.bf16.msra.mxu0 %v1217_v39 }
  0x3a   : > { %657 = vmatprep.subr.bf16.mxu0 %v1219_v40  ;;  %731 = vmatmul.mubr.bf16.gmra.mxu1 %v1250_v46 }
  0x3b   : > { %1146 = vmatpush3.bf16.msra.mxu1 %v1259_v60 }
  0x3c   : > { %1147 = vmatprep.subr.bf16.mxu1 %v1260_v61 }
  0x3d   : > { %658 = vmatpush2.bf16.msra.mxu0 %v1223_v42 }
  0x3e   : > { %659 = vmatprep.subr.bf16.mxu0 %v1225_v43 }
  0x3f   : > { %1148 = vmatpush3.bf16.msra.mxu1 %v1261_v62 }
  0x40   : > { %1149 = vmatprep.subr.bf16.mxu1 %v1262_v63 }
  0x41   : > { %660 = vmatpush2.bf16.msra.mxu0 %v1229_v44 }
  0x42   : > { %661 = vmatprep.subr.bf16.mxu0 %v1231_v45 }
  0x43   : > { %1150 = vmatpush3.bf16.msra.mxu1 %v1263_v0 }
  0x44   : > { %1151 = vmatprep.subr.bf16.mxu1 %v1264_v1 }
  0x45   : > { %662 = vmatpush2.bf16.msra.mxu0 %v1235_v47 }
  0x46   : > { %663 = vmatprep.subr.bf16.mxu0 %v1237_v48 }
  0x47   : > { %1152 = vmatpush3.bf16.msra.mxu1 %v1265_v2 }
  0x48   : > { %1153 = vmatprep.subr.bf16.mxu1 %v1266_v3 }
  0x49   : > { %664 = vmatpush2.bf16.msra.mxu0 %v1241_v49 }
  0x4a   : > { %665 = vmatprep.subr.bf16.mxu0 %v1243_v50 }
  0x4b   : > { %1154 = vmatpush3.bf16.msra.mxu1 %v1267_v4 }
  0x4c   : > { %1155 = vmatprep.subr.bf16.mxu1 %v1268_v5 }
  0x4d   : > { %666 = vmatpush2.bf16.msra.mxu0 %v1246_v51 }
  0x4f   : > { %1156 = vmatpush3.bf16.msra.mxu1 %v1269_v6 }
  0x50   : > { %668 = vmatmul.mubr.bf16.vlgmr.msra.gmra.mxu0 %v1247_v52 }
  0x51   : > { %677 = vmatprep.mubr.bf16.mxu0 %v1251_v53 }
  0x58   : > { %678 = vmatmul.mubr.bf16.gmra.mxu0 %v1253_v54 }
  0xf2   : > { %v722_v8 = vpop.f32.mrf.mxu1 }
  0xf4   : > { %v724_v10 = vpop.f32.mrf.mxu1 }
  0xf6   : > { %v726_v14 = vpop.f32.mrf.mxu1 }
  0xf8   : > { %v728_v18 = vpop.f32.mrf.mxu1 }
  0xfa   : > { %v732_v23 = vpop.f32.mrf.mxu1 }
  0xfc   : > { %v734_v30 = vpop.f32.mrf.mxu1 }
  0xfe   : > { %v736_v41 = vpop.f32.mrf.mxu1 }
 0x100   : > { %v738_v52 = vpop.f32.mrf.mxu1 }
 0x110   : > { %v669_v17 = vpop.f32.mrf.mxu0 }
 0x111   : > { %v670_v19 = vadd.f32 %v669_v17, %v356_v15 }
 0x112   : > { %v671_v20 = vpop.f32.mrf.mxu0 }
 0x113   : > { %v672_v21 = vadd.f32 %v671_v20, %v360_v16  ;;  %v723_v24 = vadd.f32 %v722_v8, %v670_v19 }
 0x114   : > { %v673_v22 = vpop.f32.mrf.mxu0 }
 0x115   : > { %v674_v25 = vadd.f32 %v673_v22, %v356_v15  ;;  %v725_v27 = vadd.f32 %v724_v10, %v672_v21  ;;  %v741_v32 = vmax.f32 %v723_v24, 0.0 }
 0x116   : > { %v675_v26 = vpop.f32.mrf.mxu0 }
 0x117   : > { %v727_v28 = vadd.f32 %v726_v14, %v674_v25  ;;  %v676_v29 = vadd.f32 %v675_v26, %v360_v16  ;;  %v742_v37 = vmax.f32 %v725_v27, 0.0 }
 0x118   : > { %v679_v31 = vpop.f32.mrf.mxu0 }
 0x119   : > { %v743_v33 = vmax.f32 %v727_v28, 0.0  ;;  %v729_v34 = vadd.f32 %v728_v18, %v676_v29  ;;  %v680_v35 = vadd.f32 %v679_v31, %v356_v15 }
 0x11a   : > { %v681_v36 = vpop.f32.mrf.mxu0 }
 0x11b   : > { %v749_v38 = vadd.f32 %v743_v33, %v741_v32  ;;  %v744_v39 = vmax.f32 %v729_v34, 0.0  ;;  %v682_v40 = vadd.f32 %v681_v36, %v360_v16  ;;  %v733_v45 = vadd.f32 %v732_v23, %v680_v35  ;;  %v1121_v23 = vld [vmem:[%s289_s13] ss:$0 sm:$0xff] }
 0x11c   : > { %v683_v42 = vpop.f32.mrf.mxu0 }
 0x11d   : > { %v750_v43 = vrot.slane %v749_v38, 4  ;;  %v756_v44 = vadd.f32 %v744_v39, %v742_v37  ;;  %v684_v46 = vadd.f32 %v683_v42, %v356_v15  ;;  %v735_v49 = vadd.f32 %v734_v30, %v682_v40 }
 0x11e   : > { %v685_v47 = vpop.f32.mrf.mxu0  ;;  %v745_v56 = vmax.f32 %v733_v45, 0.0 }
 0x11f   : > { %v757_v48 = vrot.slane %v756_v44, 4  ;;  %v686_v50 = vadd.f32 %v685_v47, %v360_v16  ;;  %v751_v51 = vadd.f32 %v750_v43, %v749_v38  ;;  %v737_v53 = vadd.f32 %v736_v41, %v684_v46 }
 0x120   : > { %v746_v58 = vmax.f32 %v735_v49, 0.0 }
 0x121   : > { %v758_v54 = vadd.f32 %v757_v48, %v756_v44  ;;  %v739_v55 = vadd.f32 %v738_v52, %v686_v50  ;;  %v747_v57 = vmax.f32 %v737_v53, 0.0  ;;  %v752_v60 = vrot.slane %v751_v51, 2 }
 0x123   : > { %v748_v59 = vmax.f32 %v739_v55, 0.0  ;;  %v763_v61 = vadd.f32 %v747_v57, %v745_v56  ;;  %v759_v62 = vrot.slane %v758_v54, 2  ;;  %v753_v2 = vadd.f32 %v752_v60, %v751_v51 }
 0x125   : > { %v770_v63 = vadd.f32 %v748_v59, %v746_v58  ;;  %v764_v0 = vrot.slane %v763_v61, 4  ;;  %v760_v4 = vadd.f32 %v759_v62, %v758_v54  ;;  %v754_v8 = vrot.slane %v753_v2, 1 }
 0x127   : > { %v771_v1 = vrot.slane %v770_v63, 4  ;;  %v765_v3 = vadd.f32 %v764_v0, %v763_v61  ;;  %v761_v11 = vrot.slane %v760_v4, 1  ;;  %v755_v14 = vadd.f32 %v754_v8, %v753_v2 }
 0x129   : > { %v772_v5 = vadd.f32 %v771_v1, %v770_v63  ;;  %v766_v6 = vrot.slane %v765_v3, 2  ;;  %v762_v16 = vadd.f32 %v761_v11, %v760_v4 }
 0x12b   : > { %v773_v7 = vrot.slane %v772_v5, 2  ;;  %v767_v9 = vadd.f32 %v766_v6, %v765_v3 }
 0x12d   : > { %v774_v10 = vadd.f32 %v773_v7, %v772_v5  ;;  %v768_v12 = vrot.slane %v767_v9, 1 }
 0x12f   : > { %v775_v13 = vrot.slane %v774_v10, 1  ;;  %v769_v15 = vadd.f32 %v768_v12, %v767_v9 }
 0x131   : > { %v776_v17 = vadd.f32 %v775_v13, %v774_v10  ;;  %v778_v18 = vsel %vm777_vm0, %v755_v14, %v769_v15 }
 0x132   : > { %v780_v21 = vpack.c.bf16 %v778_v18, %v778_v18 }
 0x133   : > { %v779_v19 = vsel %vm777_vm0, %v762_v16, %v776_v17 }
 0x134   : > { %v781_v20 = vpack.c.bf16 %v779_v19, %v779_v19 }
 0x136   : > { %949 = vmatprep.mubr.bf16.mxu1 %v781_v20 }
 0x137   : > { %950 = vmatmul.mubr.bf16.vlgmr.msra.gmra.mxu1 %v780_v21 }
 0x1f7   : > { %v1157_v22 = vpop.f32.mrf.mxu1 }
 0x1f9   : > { %v1158_v24 = vpop.f32.mrf.mxu1 }
 0x1fa   : > { %v1159_v25 = vadd.f32 %v1158_v24, %v1157_v22 }
 0x1fb   : > { %v1160_v26 = vpop.f32.mrf.mxu1 }
 0x1fc   : > { %v952_v27 = vadd.f32 %v1159_v25, %v1121_v23 }
 0x1fd   : > { %v1161_v28 = vpop.f32.mrf.mxu1 }
 0x1fe   : > { %957 = vst [vmem:[%s293_s16] sm:$0x3] %v952_v27 }
 0x1ff PF: > { %s15_s18 = sadd.s32 1, %s1276_s18  }
 0x200   : > { %p12_p4 = scmp.ge.s32.totalorder %s15_s18, 4  }
 0x202   :  { %14 = sbr.rel (!%p12_p4) target bundleno = 1 (0x1), region = 82 }

</bundles_post_ra>
